<compile_context>
chip_gen: v7x
topology: tpu7x:2x2x1
jax: 0.10.0
libtpu: 0.0.40
codegen_flags: <defaults>
</compile_context>

<pallas_src>
import jax
import jax.numpy as jnp
from jax import lax
from jax.experimental import pallas as pl
from jax.experimental.pallas import tpu as pltpu


def _vmem_limit_bytes():
    """~75% of physical VMEM for this generation (v5e/v6e 128MiB, v7x 64MiB)."""
    try:
        cap = int(pltpu.get_tpu_info().vmem_capacity_bytes)
        return max(32 << 20, min((cap * 3) // 4, 100 << 20))
    except Exception:
        return 32 << 20          # safe default on every generation


def ncn_kernel(idx_ref, x_ref, a_ref, xw1d_ref,
               w1a_ref, w1b_ref, w1c_ref, b1_ref, w2_ref, b2_ref, out_ref):
    te = idx_ref.shape[0]
    n = a_ref.shape[0]

    ids = idx_ref[...]                                    # (te, 2) int32
    iota = lax.broadcasted_iota(jnp.int32, (te, n), 1)
    oh_i = (iota == ids[:, 0:1]).astype(jnp.float32)      # one-hot of tar_i
    oh_j = (iota == ids[:, 1:2]).astype(jnp.float32)      # one-hot of tar_j

    # Feature gathers: one-hot selection matmuls against VMEM-resident x.
    x = x_ref[...]                                        # (N, F) f32
    xi = jnp.dot(oh_i, x, preferred_element_type=jnp.float32)   # (te, F)
    xj = jnp.dot(oh_j, x, preferred_element_type=jnp.float32)   # (te, F)

    # Adjacency-row gathers in bf16 (counts are exact), f32 accumulation.
    a = a_ref[...]                                        # (N, N) bf16 counts
    oh_i16 = oh_i.astype(jnp.bfloat16)
    oh_j16 = oh_j.astype(jnp.bfloat16)
    ai = jnp.dot(oh_i16, a, preferred_element_type=jnp.float32)  # A[tar_i] (te, N)
    aj = jnp.dot(oh_j16, a, preferred_element_type=jnp.float32)  # A[tar_j] (te, N)

    # Scalar adjacency entries A[tar_j, tar_i] / A[tar_i, tar_j].
    aji = jnp.sum(oh_i * aj, axis=-1, keepdims=True)      # (te, 1)
    aij = jnp.sum(oh_j * ai, axis=-1, keepdims=True)      # (te, 1)

    # Split-W1 MLP input: the F=16-wide lane concat is eliminated by slicing
    # W1 row-wise (wrapper) and reassociating the common-neighbor branch
    # ((Ai ⊙ Aj) @ x) @ W1d  ->  (Ai ⊙ Aj) @ (x @ W1d).
    h = jnp.dot(xi * xj, w1a_ref[...], preferred_element_type=jnp.float32)
    h += aji * jnp.dot(xi, w1b_ref[...], preferred_element_type=jnp.float32)
    h += aij * jnp.dot(xj, w1c_ref[...], preferred_element_type=jnp.float32)
    cn = (ai * aj).astype(jnp.bfloat16)   # common-neighbor counts (exact <= 256)
    h += jnp.dot(cn, xw1d_ref[...], preferred_element_type=jnp.float32)
    h += b1_ref[...]
    # (xs.relu() in the reference is an unassigned no-op -> intentionally omitted)
    h = jnp.maximum(h, 0.0)               # ReLU inside the MLP

    out = jnp.dot(h, w2_ref[...], preferred_element_type=jnp.float32) + b2_ref[...]
    out_ref[...] = out.astype(out_ref.dtype)


def _build_adjacency(num_nodes, edge_index):
    """Dense symmetric adjacency, duplicate edges summed (matches
    SparseTensor.from_edge_index(...).fill_value_(1.0).coalesce())."""
    A = jnp.zeros((num_nodes, num_nodes), jnp.float32)
    A = A.at[edge_index[0], edge_index[1]].add(1.0)
    A = A.at[edge_index[1], edge_index[0]].add(1.0)
    return A


def ncn_predictor_forward(x, edge_index, tar_ei, params, *, te=None):
    """NCN_mode = 0 (k = 4). x: [N, F] f32, edge_index: [2, M] i32, tar_ei: [2, E] i32."""
    N, F = x.shape
    E = tar_ei.shape[1]
    w1, b1, w2, b2 = params            # w1: [4F,H], b1: [1,H], w2: [H,O], b2: [1,O]
    H = w1.shape[1]
    O = w2.shape[1]

    vmem_limit = _vmem_limit_bytes()
    hp = lax.Precision.HIGHEST

    A16 = _build_adjacency(N, edge_index).astype(jnp.bfloat16)   # counts exact in bf16

    # Split W1 by source block (static slices are free) + reassociated CN term.
    w1a = w1[0 * F:1 * F]                            # xij
    w1b = w1[1 * F:2 * F]                            # xcn_0_1
    w1c = w1[2 * F:3 * F]                            # xcn_1_0
    xw1d = jnp.dot(x, w1[3 * F:4 * F], precision=hp).astype(jnp.bfloat16)  # (N, H)

    # ---- edge-tile selection -------------------------------------------------
    if te is None:
        # Constant blocks counted twice (Pallas revolving buffers), see TODO above.
        resident = 2 * (2 * N * N + 4 * N * F + 2 * N * H
                        + 3 * 4 * F * H + 4 * H + 4 * H * O + 4 * O)
        budget = (vmem_limit * 3) // 4
        te = 1024
        while te > 128:
            per_edge = (2 * (2 * 4 + O * 4)            # idx in + out blocks, 2 bufs
                        + N * (3 * 4 + 3 * 2)          # oh/ai/aj f32 + oh/cn bf16 live
                        + 4 * (2 * F + H + O))         # xi/xj/h/out live
            if resident + te * per_edge <= budget:
                break
            te //= 2
        # Keep >=4 grid steps: feeds both v7x TensorCores and the DMA pipeline.
        while te > 128 and pl.cdiv(E, te) < 4:
            te //= 2

    n_tiles = pl.cdiv(E, te)
    E_pad = n_tiles * te

    # Only per-edge HBM input: the (E_pad, 2) target-index block.
    idx = jnp.stack([tar_ei[0], tar_ei[1]], axis=-1).astype(jnp.int32)
    idx = jnp.pad(idx, ((0, E_pad - E), (0, 0)))     # padded rows reuse node 0; sliced off

    def edge_spec(last):
        return pl.BlockSpec((te, last), lambda i: (i, 0))

    def const_spec(shape):
        return pl.BlockSpec(shape, lambda i: (0, 0))

    out = pl.pallas_call(
        ncn_kernel,
        out_shape=jax.ShapeDtypeStruct((E_pad, O), jnp.float32),
        grid=(n_tiles,),
        in_specs=[
            edge_spec(2),                                   # tar_i / tar_j indices
            const_spec((N, F)),                             # x (VMEM-resident)
            const_spec((N, N)),                             # A, bf16 counts
            const_spec((N, H)),                             # x @ W1d, bf16
            const_spec((F, H)), const_spec((F, H)), const_spec((F, H)),  # W1a..c
            const_spec((1, H)),                             # b1
            const_spec((H, O)), const_spec((1, O)),         # W2, b2
        ],
        out_specs=edge_spec(O),
        compiler_params=pltpu.CompilerParams(
            dimension_semantics=("parallel",),              # megacore-shard the edge axis
            vmem_limit_bytes=vmem_limit),
    )(idx, x, A16, xw1d, w1a, w1b, w1c, b1, w2, b2)

    return out[:E]


def reference_forward(x, edge_index, tar_ei, params):
    """Pure-JAX reference (mirrors the PyTorch module, concat layout, f32)."""
    hp = lax.Precision.HIGHEST
    N, F = x.shape
    w1, b1, w2, b2 = params
    A = _build_adjacency(N, edge_index)
    ti, tj = tar_ei[0], tar_ei[1]
    xi, xj = x[ti], x[tj]
    xij = xi * xj
    xcn01 = A[tj, ti][:, None] * xi
    xcn10 = A[ti, tj][:, None] * xj
    xcn11 = jnp.dot(A[ti] * A[tj], x, precision=hp)
    xs = jnp.concatenate([xij, xcn01, xcn10, xcn11], axis=-1)
    h = jnp.maximum(jnp.dot(xs, w1, precision=hp) + b1, 0.0)
    return jnp.dot(h, w2, precision=hp) + b2


def matched_precision_reference(x, edge_index, tar_ei, params):
    """Same algebra as the kernel (split W1, reassociated CN term, bf16 x@W1d)."""
    hp = lax.Precision.HIGHEST
    N, F = x.shape
    w1, b1, w2, b2 = params
    A = _build_adjacency(N, edge_index)
    ti, tj = tar_ei[0], tar_ei[1]
    xi, xj = x[ti], x[tj]
    aji = A[tj, ti][:, None]
    aij = A[ti, tj][:, None]
    xw1d = jnp.dot(x, w1[3 * F:], precision=hp).astype(jnp.bfloat16).astype(jnp.float32)
    h = (jnp.dot(xi * xj, w1[:F], precision=hp)
         + aji * jnp.dot(xi, w1[F:2 * F], precision=hp)
         + aij * jnp.dot(xj, w1[2 * F:3 * F], precision=hp)
         + jnp.dot(A[ti] * A[tj], xw1d, precision=hp)
         + b1)
    h = jnp.maximum(h, 0.0)
    return jnp.dot(h, w2, precision=hp) + b2


def init_params(key, in_channels, hidden_channels, out_channels, k=4):
    """Deterministic nn.Linear-style init (uniform ±1/sqrt(fan_in))."""
    k1, k2, k3, k4 = jax.random.split(key, 4)
    fan1 = k * in_channels
    lim1 = 1.0 / jnp.sqrt(fan1)
    w1 = jax.random.uniform(k1, (fan1, hidden_channels), jnp.float32, -lim1, lim1)
    b1 = jax.random.uniform(k2, (1, hidden_channels), jnp.float32, -lim1, lim1)
    lim2 = 1.0 / jnp.sqrt(hidden_channels)
    w2 = jax.random.uniform(k3, (hidden_channels, out_channels), jnp.float32, -lim2, lim2)
    b2 = jax.random.uniform(k4, (1, out_channels), jnp.float32, -lim2, lim2)
    return w1, b1, w2, b2


if __name__ == "__main__":
    # Small, deterministic test shapes (NCN_mode = 0 -> k = 4).
    N = 64            # nodes
    F = 16            # in_channels
    H = 32            # hidden_channels
    O = 8             # out_channels
    M = 96            # graph edges
    E = 512           # target edges to score (heuristic -> te=128, 4-step grid)

    key = jax.random.PRNGKey(0)
    kx, ke, kt, kp = jax.random.split(key, 4)

    x = jax.random.normal(kx, (N, F), jnp.float32)
    edge_index = jax.random.randint(ke, (2, M), 0, N, jnp.int32)
    tar_ei = jax.random.randint(kt, (2, E), 0, N, jnp.int32)
    params = init_params(kp, F, H, O, k=4)

    out = ncn_predictor_forward(x, edge_index, tar_ei, params)
    out = jax.block_until_ready(out)
    assert out.shape == (E, O)

    # Tight check against a reference with the kernel's (intentional) bf16
    # rounding of x@W1d -> verifies the lowering itself.
    ref_match = matched_precision_reference(x, edge_index, tar_ei, params)
    err_m = float(jnp.max(jnp.abs(out - ref_match)))
    assert jnp.allclose(out, ref_match, atol=1e-3, rtol=1e-3), f"matched max err {err_m}"

    # Loose check against the true f32 module semantics; the gap is dominated
    # by the bf16 rounding of the x@W1d constant (review-approved trade-off).
    ref = reference_forward(x, edge_index, tar_ei, params)
    err = float(jnp.max(jnp.abs(out - ref)))
    assert jnp.allclose(out, ref, atol=5e-2, rtol=5e-2), f"max abs err {err}"

    print("KERNEL_OK")
</pallas_src>

<mosaic_0001>
module attributes {stable_mosaic.version = 11 : i64} {
  func.func @ncn_kernel(%arg0: i32, %arg1: memref<128x2xi32, #tpu.memory_space<vmem>>, %arg2: memref<64x16xf32, #tpu.memory_space<vmem>>, %arg3: memref<64x64xbf16, #tpu.memory_space<vmem>>, %arg4: memref<64x32xbf16, #tpu.memory_space<vmem>>, %arg5: memref<16x32xf32, #tpu.memory_space<vmem>>, %arg6: memref<16x32xf32, #tpu.memory_space<vmem>>, %arg7: memref<16x32xf32, #tpu.memory_space<vmem>>, %arg8: memref<1x32xf32, #tpu.memory_space<vmem>>, %arg9: memref<32x8xf32, #tpu.memory_space<vmem>>, %arg10: memref<1x8xf32, #tpu.memory_space<vmem>>, %arg11: memref<128x8xf32, #tpu.memory_space<vmem>>) attributes {dimension_semantics = [#tpu.dimension_semantics<parallel>], iteration_bounds = array<i64: 4>, scalar_prefetch = 0 : i64, scratch_operands = 0 : i64, tpu.core_type = #tpu.core_type<tc>, window_params = [{transform_indices = @transform_0, window_bounds = array<i64: 128, 2>}, {pipeline_mode = #tpu.pipeline_mode<synchronous>, transform_indices = @transform_1, window_bounds = array<i64: 64, 16>}, {pipeline_mode = #tpu.pipeline_mode<synchronous>, transform_indices = @transform_2, window_bounds = array<i64: 64, 64>}, {pipeline_mode = #tpu.pipeline_mode<synchronous>, transform_indices = @transform_3, window_bounds = array<i64: 64, 32>}, {pipeline_mode = #tpu.pipeline_mode<synchronous>, transform_indices = @transform_4, window_bounds = array<i64: 16, 32>}, {pipeline_mode = #tpu.pipeline_mode<synchronous>, transform_indices = @transform_5, window_bounds = array<i64: 16, 32>}, {pipeline_mode = #tpu.pipeline_mode<synchronous>, transform_indices = @transform_6, window_bounds = array<i64: 16, 32>}, {pipeline_mode = #tpu.pipeline_mode<synchronous>, transform_indices = @transform_7, window_bounds = array<i64: 1, 32>}, {pipeline_mode = #tpu.pipeline_mode<synchronous>, transform_indices = @transform_8, window_bounds = array<i64: 32, 8>}, {pipeline_mode = #tpu.pipeline_mode<synchronous>, transform_indices = @transform_9, window_bounds = array<i64: 1, 8>}, {transform_indices = @transform_10, window_bounds = array<i64: 128, 8>}]} {
    %c0 = arith.constant 0 : index
    %c0_0 = arith.constant 0 : index
    %0 = vector.load %arg1[%c0, %c0_0] : memref<128x2xi32, #tpu.memory_space<vmem>>, vector<128x2xi32>
    %1 = tpu.iota {dimensions = array<i32: 1>} : vector<128x64xi32>
    %2 = vector.extract_strided_slice %0 {offsets = [0, 0], sizes = [128, 1], strides = [1, 1]} : vector<128x2xi32> to vector<128x1xi32>
    %3 = vector.broadcast %2 : vector<128x1xi32> to vector<128x64xi32>
    %4 = arith.cmpi eq, %1, %3 : vector<128x64xi32>
    %5 = arith.extui %4 : vector<128x64xi1> to vector<128x64xi32>
    %6 = arith.sitofp %5 : vector<128x64xi32> to vector<128x64xf32>
    %7 = vector.extract_strided_slice %0 {offsets = [0, 1], sizes = [128, 1], strides = [1, 1]} : vector<128x2xi32> to vector<128x1xi32>
    %8 = vector.broadcast %7 : vector<128x1xi32> to vector<128x64xi32>
    %9 = arith.cmpi eq, %1, %8 : vector<128x64xi32>
    %10 = arith.extui %9 : vector<128x64xi1> to vector<128x64xi32>
    %11 = arith.sitofp %10 : vector<128x64xi32> to vector<128x64xf32>
    %c0_1 = arith.constant 0 : index
    %c0_2 = arith.constant 0 : index
    %12 = vector.load %arg2[%c0_1, %c0_2] : memref<64x16xf32, #tpu.memory_space<vmem>>, vector<64x16xf32>
    %cst = arith.constant dense<0.000000e+00> : vector<128x16xf32>
    %13 = tpu.matmul %6, %12, %cst {dimension_numbers = #tpu.dot_dimension_numbers<[1], [0], [0], [1], [0, 0, 1, 1], [], []>} : vector<128x64xf32>, vector<64x16xf32>, vector<128x16xf32> -> vector<128x16xf32>
    %cst_3 = arith.constant dense<0.000000e+00> : vector<128x16xf32>
    %14 = tpu.matmul %11, %12, %cst_3 {dimension_numbers = #tpu.dot_dimension_numbers<[1], [0], [0], [1], [0, 0, 1, 1], [], []>} : vector<128x64xf32>, vector<64x16xf32>, vector<128x16xf32> -> vector<128x16xf32>
    %c0_4 = arith.constant 0 : index
    %c0_5 = arith.constant 0 : index
    %15 = vector.load %arg3[%c0_4, %c0_5] : memref<64x64xbf16, #tpu.memory_space<vmem>>, vector<64x64xbf16>
    %16 = arith.truncf %6 : vector<128x64xf32> to vector<128x64xbf16>
    %17 = arith.truncf %11 : vector<128x64xf32> to vector<128x64xbf16>
    %cst_6 = arith.constant dense<0.000000e+00> : vector<128x64xf32>
    %18 = tpu.matmul %16, %15, %cst_6 {dimension_numbers = #tpu.dot_dimension_numbers<[1], [0], [0], [1], [0, 0, 1, 1], [], []>} : vector<128x64xbf16>, vector<64x64xbf16>, vector<128x64xf32> -> vector<128x64xf32>
    %cst_7 = arith.constant dense<0.000000e+00> : vector<128x64xf32>
    %19 = tpu.matmul %17, %15, %cst_7 {dimension_numbers = #tpu.dot_dimension_numbers<[1], [0], [0], [1], [0, 0, 1, 1], [], []>} : vector<128x64xbf16>, vector<64x64xbf16>, vector<128x64xf32> -> vector<128x64xf32>
    %20 = arith.mulf %6, %19 : vector<128x64xf32>
    %cst_8 = arith.constant dense<0.000000e+00> : vector<128xf32>
    %21 = vector.multi_reduction <add>, %20, %cst_8 [1] : vector<128x64xf32> to vector<128xf32>
    %22 = vector.shape_cast %21 : vector<128xf32> to vector<128x1xf32>
    %23 = arith.mulf %11, %18 : vector<128x64xf32>
    %cst_9 = arith.constant dense<0.000000e+00> : vector<128xf32>
    %24 = vector.multi_reduction <add>, %23, %cst_9 [1] : vector<128x64xf32> to vector<128xf32>
    %25 = vector.shape_cast %24 : vector<128xf32> to vector<128x1xf32>
    %26 = arith.mulf %13, %14 : vector<128x16xf32>
    %c0_10 = arith.constant 0 : index
    %c0_11 = arith.constant 0 : index
    %27 = vector.load %arg5[%c0_10, %c0_11] : memref<16x32xf32, #tpu.memory_space<vmem>>, vector<16x32xf32>
    %cst_12 = arith.constant dense<0.000000e+00> : vector<128x32xf32>
    %28 = tpu.matmul %26, %27, %cst_12 {dimension_numbers = #tpu.dot_dimension_numbers<[1], [0], [0], [1], [0, 0, 1, 1], [], []>} : vector<128x16xf32>, vector<16x32xf32>, vector<128x32xf32> -> vector<128x32xf32>
    %c0_13 = arith.constant 0 : index
    %c0_14 = arith.constant 0 : index
    %29 = vector.load %arg6[%c0_13, %c0_14] : memref<16x32xf32, #tpu.memory_space<vmem>>, vector<16x32xf32>
    %cst_15 = arith.constant dense<0.000000e+00> : vector<128x32xf32>
    %30 = tpu.matmul %13, %29, %cst_15 {dimension_numbers = #tpu.dot_dimension_numbers<[1], [0], [0], [1], [0, 0, 1, 1], [], []>} : vector<128x16xf32>, vector<16x32xf32>, vector<128x32xf32> -> vector<128x32xf32>
    %31 = vector.broadcast %22 : vector<128x1xf32> to vector<128x32xf32>
    %32 = arith.mulf %31, %30 : vector<128x32xf32>
    %33 = arith.addf %28, %32 : vector<128x32xf32>
    %c0_16 = arith.constant 0 : index
    %c0_17 = arith.constant 0 : index
    %34 = vector.load %arg7[%c0_16, %c0_17] : memref<16x32xf32, #tpu.memory_space<vmem>>, vector<16x32xf32>
    %cst_18 = arith.constant dense<0.000000e+00> : vector<128x32xf32>
    %35 = tpu.matmul %14, %34, %cst_18 {dimension_numbers = #tpu.dot_dimension_numbers<[1], [0], [0], [1], [0, 0, 1, 1], [], []>} : vector<128x16xf32>, vector<16x32xf32>, vector<128x32xf32> -> vector<128x32xf32>
    %36 = vector.broadcast %25 : vector<128x1xf32> to vector<128x32xf32>
    %37 = arith.mulf %36, %35 : vector<128x32xf32>
    %38 = arith.addf %33, %37 : vector<128x32xf32>
    %39 = arith.mulf %18, %19 : vector<128x64xf32>
    %40 = arith.truncf %39 : vector<128x64xf32> to vector<128x64xbf16>
    %c0_19 = arith.constant 0 : index
    %c0_20 = arith.constant 0 : index
    %41 = vector.load %arg4[%c0_19, %c0_20] : memref<64x32xbf16, #tpu.memory_space<vmem>>, vector<64x32xbf16>
    %cst_21 = arith.constant dense<0.000000e+00> : vector<128x32xf32>
    %42 = tpu.matmul %40, %41, %cst_21 {dimension_numbers = #tpu.dot_dimension_numbers<[1], [0], [0], [1], [0, 0, 1, 1], [], []>} : vector<128x64xbf16>, vector<64x32xbf16>, vector<128x32xf32> -> vector<128x32xf32>
    %43 = arith.addf %38, %42 : vector<128x32xf32>
    %c0_22 = arith.constant 0 : index
    %c0_23 = arith.constant 0 : index
    %44 = vector.load %arg8[%c0_22, %c0_23] : memref<1x32xf32, #tpu.memory_space<vmem>>, vector<1x32xf32>
    %45 = vector.broadcast %44 : vector<1x32xf32> to vector<128x32xf32>
    %46 = arith.addf %43, %45 : vector<128x32xf32>
    %cst_24 = arith.constant 0.000000e+00 : f32
    %47 = vector.broadcast %cst_24 : f32 to vector<128x32xf32>
    %48 = arith.maximumf %46, %47 : vector<128x32xf32>
    %c0_25 = arith.constant 0 : index
    %c0_26 = arith.constant 0 : index
    %49 = vector.load %arg9[%c0_25, %c0_26] : memref<32x8xf32, #tpu.memory_space<vmem>>, vector<32x8xf32>
    %cst_27 = arith.constant dense<0.000000e+00> : vector<128x8xf32>
    %50 = tpu.matmul %48, %49, %cst_27 {dimension_numbers = #tpu.dot_dimension_numbers<[1], [0], [0], [1], [0, 0, 1, 1], [], []>} : vector<128x32xf32>, vector<32x8xf32>, vector<128x8xf32> -> vector<128x8xf32>
    %c0_28 = arith.constant 0 : index
    %c0_29 = arith.constant 0 : index
    %51 = vector.load %arg10[%c0_28, %c0_29] : memref<1x8xf32, #tpu.memory_space<vmem>>, vector<1x8xf32>
    %52 = vector.broadcast %51 : vector<1x8xf32> to vector<128x8xf32>
    %53 = arith.addf %50, %52 : vector<128x8xf32>
    %c0_30 = arith.constant 0 : index
    %c0_31 = arith.constant 0 : index
    %54 = vector.load %arg11[%c0_30, %c0_31] : memref<128x8xf32, #tpu.memory_space<vmem>>, vector<128x8xf32>
    tpu.vector_store %arg11[%c0_30, %c0_31], %53 {strides = array<i32>} : memref<128x8xf32, #tpu.memory_space<vmem>>, vector<128x8xf32>,
    return
  }
  func.func @transform_0(%arg0: i32) -> (i32, i32) {
    %c0_i32 = arith.constant 0 : i32
    %c0_i32_0 = arith.constant 0 : i32
    return %arg0, %c0_i32 : i32, i32
  }
  func.func @transform_1(%arg0: i32) -> (i32, i32) {
    %c0_i32 = arith.constant 0 : i32
    %c0_i32_0 = arith.constant 0 : i32
    %c0_i32_1 = arith.constant 0 : i32
    return %c0_i32, %c0_i32_0 : i32, i32
  }
  func.func @transform_2(%arg0: i32) -> (i32, i32) {
    %c0_i32 = arith.constant 0 : i32
    %c0_i32_0 = arith.constant 0 : i32
    %c0_i32_1 = arith.constant 0 : i32
    return %c0_i32, %c0_i32_0 : i32, i32
  }
  func.func @transform_3(%arg0: i32) -> (i32, i32) {
    %c0_i32 = arith.constant 0 : i32
    %c0_i32_0 = arith.constant 0 : i32
    %c0_i32_1 = arith.constant 0 : i32
    return %c0_i32, %c0_i32_0 : i32, i32
  }
  func.func @transform_4(%arg0: i32) -> (i32, i32) {
    %c0_i32 = arith.constant 0 : i32
    %c0_i32_0 = arith.constant 0 : i32
    %c0_i32_1 = arith.constant 0 : i32
    return %c0_i32, %c0_i32_0 : i32, i32
  }
  func.func @transform_5(%arg0: i32) -> (i32, i32) {
    %c0_i32 = arith.constant 0 : i32
    %c0_i32_0 = arith.constant 0 : i32
    %c0_i32_1 = arith.constant 0 : i32
    return %c0_i32, %c0_i32_0 : i32, i32
  }
  func.func @transform_6(%arg0: i32) -> (i32, i32) {
    %c0_i32 = arith.constant 0 : i32
    %c0_i32_0 = arith.constant 0 : i32
    %c0_i32_1 = arith.constant 0 : i32
    return %c0_i32, %c0_i32_0 : i32, i32
  }
  func.func @transform_7(%arg0: i32) -> (i32, i32) {
    %c0_i32 = arith.constant 0 : i32
    %c0_i32_0 = arith.constant 0 : i32
    %c0_i32_1 = arith.constant 0 : i32
    return %c0_i32, %c0_i32_0 : i32, i32
  }
  func.func @transform_8(%arg0: i32) -> (i32, i32) {
    %c0_i32 = arith.constant 0 : i32
    %c0_i32_0 = arith.constant 0 : i32
    %c0_i32_1 = arith.constant 0 : i32
    return %c0_i32, %c0_i32_0 : i32, i32
  }
  func.func @transform_9(%arg0: i32) -> (i32, i32) {
    %c0_i32 = arith.constant 0 : i32
    %c0_i32_0 = arith.constant 0 : i32
    %c0_i32_1 = arith.constant 0 : i32
    return %c0_i32, %c0_i32_0 : i32, i32
  }
  func.func @transform_10(%arg0: i32) -> (i32, i32) {
    %c0_i32 = arith.constant 0 : i32
    %c0_i32_0 = arith.constant 0 : i32
    return %arg0, %c0_i32 : i32, i32
  }
}

</mosaic_0001>

<bundles_post_ra>
// kernel: tpu_custom_call.1
= control target key start
LH: loop header
LB: loop body
LE: loop exit
PB: predicated region body
PF: predicated region fallthrough
CT: control target
= control target key end

     0   :  { %s3304_s13 = smov 0   ;;  %s4168_s0 = inlined_call_operand.vmem [shape: s32[512,2], index: 0, kind: input, shape index: {}]   ;;  %s4169_s1 = inlined_call_operand.vmem [shape: f32[64,16], index: 1, kind: input, shape index: {}]   ;;  %s4170_s2 = inlined_call_operand.vmem [shape: bf16[64,64], index: 2, kind: input, shape index: {}]   ;;  %s4171_s3 = inlined_call_operand.vmem [shape: bf16[64,32], index: 3, kind: input, shape index: {}]   ;;  %s4172_s4 = inlined_call_operand.vmem [shape: f32[16,32], index: 4, kind: input, shape index: {}]   ;;  %s4173_s5 = inlined_call_operand.vmem [shape: f32[16,32], index: 5, kind: input, shape index: {}]   ;;  %s4174_s6 = inlined_call_operand.vmem [shape: f32[16,32], index: 6, kind: input, shape index: {}]   ;;  %s4175_s7 = inlined_call_operand.vmem [shape: f32[1,32], index: 7, kind: input, shape index: {}]   ;;  %s4176_s8 = inlined_call_operand.vmem [shape: f32[32,8], index: 8, kind: input, shape index: {}]   ;;  %s4177_s9 = inlined_call_operand.vmem [shape: f32[1,8], index: 9, kind: input, shape index: {}]   ;;  %s4178_s10 = inlined_call_operand.vmem [shape: f32[512,8], index: 10, kind: output, shape index: {}]  }
   0x1 LB: > { %s2547_s14 = sadd.s32 4294967295, %s3244_s13   ;;  %p2551_p0 = scmp.ge.s32.totalorder %s3244_s13, 1  ;;  %s3244_s13 = sphi %s3304_s13, %s20_s13  }
   0x2   : > { %p313_p1 = scmp.lt.s32.totalorder %s3244_s13, 5 }
   0x4   : > { %p314_p2 = pnand %p2551_p0, %p313_p1 }
   0x5   : > { %s2552_s15 = sshll.u32 (!%p314_p2), %s2547_s14, 4  ;;  %v574_v0 = vld [vmem:[%s4169_s1] sm:$0xff] (!%p314_p2)  ;;  %v575_v1 = vld [vmem:[%s4169_s1 + $0x8] sm:$0xff] (!%p314_p2)  ;;  %v3246_v2 = vmov (!%p314_p2), 1   ;;  %v3247_v3 = vmov (!%p314_p2), 0   ;;  %v576_v10 = vld [vmem:[%s4169_s1 + $0x10] sm:$0xff] (!%p314_p2)  ;;  %v380_v33 = vlaneseq (!%p314_p2) }
   0x6   : > { %317 = sbr.rel (%p314_p2) target bundleno = 914 (0x392), region = 60  ;;  %3218 = vset.pattern.permute.xlu0 (!%p314_p2), %v3246_v2  ;;  %3217 = vset.pattern.permute.xlu1 (!%p314_p2), %v3247_v3  ;;  %p352_p3 = scmp.lt.s32.totalorder (!%p314_p2), %s2552_s15, 63  ;;  %v3320_v4 = vpack.c.bf16 (!%p314_p2), %v575_v1, %v574_v0  ;;  %v577_v11 = vld [vmem:[%s4169_s1 + $0x18] sm:$0xff] (!%p314_p2)  ;;  %v578_v13 = vld [vmem:[%s4169_s1 + $0x20] sm:$0xff] (!%p314_p2)  ;;  %v579_v14 = vld [vmem:[%s4169_s1 + $0x28] sm:$0xff] (!%p314_p2)  ;;  %vm582_vm0 = vcmask (!%p314_p2), 523264  }
   0x7   : > { %v3350_v12 = vpack.c.bf16 (!%p314_p2), %v577_v11, %v576_v10  ;;  %v3359_v16 = vpack.c.bf16 (!%p314_p2), %v579_v14, %v578_v13  ;;  %v580_v17 = vld [vmem:[%s4169_s1 + $0x30] sm:$0xff] (!%p314_p2)  ;;  %v581_v18 = vld [vmem:[%s4169_s1 + $0x38] sm:$0xff] (!%p314_p2)  ;;  %v3402_v29 = vld [vmem:[%s4170_s2] sm:$0xff] (!%p314_p2)   ;;  %v3412_v36 = vand.u32 (!%p314_p2), 127, %v380_v33  ;;  %v3248_v39 = vmov (!%p314_p2), 0.0  }
   0x8   : > { %3198 = vmatprep.subr.bf16.mxu1 (!%p314_p2), %v3320_v4  ;;  %3147 = vmatprep.subr.bf16.mxu0 (!%p314_p2), %v3320_v4  ;;  %v3374_v21 = vpack.c.bf16 (!%p314_p2), %v581_v18, %v580_v17  ;;  %v3231_v58 = vld [vmem:[%s4170_s2 + $0x8] sm:$0xff] (!%p314_p2)   ;;  %v3232_v0 = vld [vmem:[%s4170_s2 + $0x10] sm:$0xff] (!%p314_p2)  }
   0x9   : > { %3202 = vmatpush3.bf16.msra.mxu1 (!%p314_p2), %v3320_v4  ;;  %3149 = vmatpush3.bf16.msra.mxu0 (!%p314_p2), %v3320_v4 }
   0xa   : > { %3199 = vmatprep.subr.bf16.mxu1 (!%p314_p2), %v3350_v12  ;;  %3151 = vmatprep.subr.bf16.mxu0 (!%p314_p2), %v3350_v12 }
   0xd   : > { %s4180_s15 = smov (!%p352_p3, %s2552_s15), 63  ;;  %3203 = vmatpush3.bf16.msra.mxu1 %v3350_v12  ;;  %3153 = vmatpush3.bf16.msra.mxu0 %v3350_v12 }
   0xe   : > { %s2553_s20 = sshll.u32 %s4180_s15, 3  ;;  %3200 = vmatprep.subr.bf16.mxu1 %v3359_v16  ;;  %3155 = vmatprep.subr.bf16.mxu0 %v3359_v16 }
   0xf   : > { %s3334_s23 = scalar_lea.vmem %s4168_s0, %s2553_s20  ;;  %s4131_s27 = scalar_lea.vmem %s4178_s10, %s2553_s20 }
  0x10   : > { %v3337_v5 = vld [vmem:[%s3334_s23 + $0x50] sm:$0xff]  ;;  %v364_v6 = vld [vmem:[%s3334_s23] sm:$0xff]  ;;  %v375_v7 = vld [vmem:[%s3334_s23 + $0x58] sm:$0xff] }
  0x11   : > { %413 = vperm.xlu1 %3217, %v3337_v5   ;;  %479 = vperm.xlu0 %3218, %v364_v6   ;;  %v368_v8 = vld [vmem:[%s3334_s23 + $0x20] sm:$0xff]  ;;  %v377_v9 = vld [vmem:[%s3334_s23 + $0x68] sm:$0xff]  ;;  %v379_v19 = vld [vmem:[%s3334_s23 + $0x78] sm:$0xff] }
  0x12   : > { %v372_v15 = vld [vmem:[%s3334_s23 + $0x40] sm:$0xff]  ;;  %v373_v20 = vld [vmem:[%s3334_s23 + $0x48] sm:$0xff]  ;;  %3204 = vmatpush3.bf16.msra.mxu1 %v3359_v16  ;;  %3157 = vmatpush3.bf16.msra.mxu0 %v3359_v16  ;;  %v378_v24 = vld [vmem:[%s3334_s23 + $0x70] sm:$0xff] }
  0x13   : > { %v365_v22 = vld [vmem:[%s3334_s23 + $0x8] sm:$0xff]  ;;  %v376_v23 = vld [vmem:[%s3334_s23 + $0x60] sm:$0xff]  ;;  %3201 = vmatprep.subr.bf16.mxu1 %v3374_v21  ;;  %3159 = vmatprep.subr.bf16.mxu0 %v3374_v21  ;;  %v366_v25 = vld [vmem:[%s3334_s23 + $0x10] sm:$0xff] }
  0x14   : > { %v367_v26 = vld [vmem:[%s3334_s23 + $0x18] sm:$0xff]  ;;  %v369_v27 = vld [vmem:[%s3334_s23 + $0x28] sm:$0xff]  ;;  %v370_v28 = vld [vmem:[%s3334_s23 + $0x30] sm:$0xff] }
  0x15   : > { %416 = vperm.xlu1 %3217, %v375_v7   ;;  %491 = vperm.xlu0 %3218, %v368_v8   ;;  %v371_v30 = vld [vmem:[%s3334_s23 + $0x38] sm:$0xff] }
  0x16   : > { %3205 = vmatpush3.bf16.msra.mxu1 %v3374_v21  ;;  %3161 = vmatpush3.bf16.msra.mxu0 %v3374_v21 }
  0x17   : > { %3163 = vmatprep.subr.bf16.mxu1 %v3320_v4  ;;  %2958 = vmatprep.subr.bf16.mxu0 %v3402_v29 }
  0x19   : > { %422 = vperm.xlu1 %3217, %v377_v9   ;;  %3223 = vset.pattern.permute.xlu0 %v3247_v3 }
  0x1a   : > { %407 = vperm.xlu0 %3223, %v372_v15  }
  0x1d   : > { %428 = vperm.xlu1 %3217, %v379_v19  }
  0x1e   : > { %410 = vperm.xlu0 %3223, %v373_v20  }
  0x21   : > { %3219 = vset.pattern.permute.xlu1 %v3246_v2 }
  0x22   : > { %482 = vperm.xlu1 %3219, %v365_v22   ;;  %419 = vperm.xlu0 %3223, %v376_v23  }
  0x26   : > { %3220 = vset.pattern.permute.xlu1 %v3247_v3  ;;  %425 = vperm.xlu0 %3223, %v378_v24  }
  0x27   : > { %383 = vperm.xlu1 %3220, %v364_v6  }
  0x2a   : > { %386 = vperm.xlu0 %3223, %v365_v22  }
  0x2b   : > { %3221 = vset.pattern.permute.xlu1 %v3246_v2 }
  0x2c   : > { %485 = vperm.xlu1 %3221, %v366_v25  }
  0x2e   : > { %389 = vperm.xlu0 %3223, %v366_v25  }
  0x30   : > { %488 = vperm.xlu1 %3221, %v367_v26  }
  0x32   : > { %398 = vperm.xlu0 %3223, %v369_v27  }
  0x34   : > { %3222 = vset.pattern.permute.xlu1 %v3247_v3 }
  0x35   : > { %392 = vperm.xlu1 %3222, %v367_v26  }
  0x36   : > { %401 = vperm.xlu0 %3223, %v370_v28  }
  0x39   : > { %3224 = vset.pattern.permute.xlu1 %v3246_v2 }
  0x3a   : > { %494 = vperm.xlu1 %3224, %v369_v27   ;;  %3228 = vset.pattern.permute.xlu0 %v3246_v2 }
  0x3b   : > { %503 = vperm.xlu0 %3228, %v372_v15  }
  0x3e   : > { %3225 = vset.pattern.permute.xlu1 %v3247_v3 }
  0x3f   : > { %395 = vperm.xlu1 %3225, %v368_v8   ;;  %512 = vperm.xlu0 %3228, %v375_v7  }
  0x43   : > { %3226 = vset.pattern.permute.xlu1 %v3246_v2  ;;  %518 = vperm.xlu0 %3228, %v377_v9  }
  0x44   : > { %497 = vperm.xlu1 %3226, %v370_v28  }
  0x47   : > { %524 = vperm.xlu0 %3228, %v379_v19  }
  0x48   : > { %500 = vperm.xlu1 %3226, %v371_v30  }
  0x4c   : > { %3227 = vset.pattern.permute.xlu1 %v3247_v3  ;;  %v3233_v3 = vld [vmem:[%s4170_s2 + $0x18] sm:$0xff]  }
  0x4d   : > { %404 = vperm.xlu1 %3227, %v371_v30  }
  0x51   : > { %3229 = vset.pattern.permute.xlu1 %v3246_v2 }
  0x52   : > { %506 = vperm.xlu1 %3229, %v373_v20  }
  0x56   : > { %509 = vperm.xlu1 %3229, %v3337_v5  }
  0x5a   : > { %515 = vperm.xlu1 %3229, %v376_v23  }
  0x5e   : > { %521 = vperm.xlu1 %3229, %v378_v24  }
  0x90   : > { %v414_v31 = vpop.permute.xlu1 %413  ;;  %v480_v32 = vpop.permute.xlu0 %479 }
  0x91   : > { %vm440_vm2 = vcmp.eq.s32.totalorder %v3412_v36, %v414_v31  ;;  %vm526_vm10 = vcmp.eq.s32.totalorder %v3412_v36, %v480_v32 }
  0x92   : > { %v3426_v44 = vsel %vm440_vm2, 1.0, %v3248_v39  ;;  %v3481_v59 = vsel %vm526_vm10, 1.0, %v3248_v39 }
  0x94   : > { %v417_v34 = vpop.permute.xlu1 %416  ;;  %v3410_v35 = vpop.permute.xlu0 %491 }
  0x95   : > { %vm441_vm4 = vcmp.eq.s32.totalorder %v3412_v36, %v417_v34 }
  0x96   : > { %v3437_v47 = vsel %vm441_vm4, 1.0, %v3248_v39 }
  0x98   : > { %v423_v37 = vpop.permute.xlu1 %422 }
  0x99   : > { %v408_v38 = vpop.permute.xlu0 %407  ;;  %vm443_vm6 = vcmp.eq.s32.totalorder %v3412_v36, %v423_v37 }
  0x9a   : > { %vm438_vm1 = vcmp.eq.s32.totalorder %v3412_v36, %v408_v38  ;;  %v3451_v51 = vsel %vm443_vm6, 1.0, %v3248_v39 }
  0x9b   : > { %v3416_v40 = vsel %vm438_vm1, 1.0, %v3248_v39  ;;  %vm530_vm1 = vcmp.eq.s32.totalorder %v3412_v36, %v3410_v35 }
  0x9c   : > { %v429_v41 = vpop.permute.xlu1 %428  ;;  %2906 = vmatprep.mubr.msk.f32.mxu1 %vm582_vm0, %v3416_v40 }
  0x9d   : > { %v411_v42 = vpop.permute.xlu0 %410  ;;  %vm445_vm9 = vcmp.eq.s32.totalorder %v3412_v36, %v429_v41 }
  0x9e   : > { %vm439_vm3 = vcmp.eq.s32.totalorder %v3412_v36, %v411_v42  ;;  %v3472_v55 = vsel %vm445_vm9, 1.0, %v3248_v39 }
  0x9f   : > { %v3423_v43 = vsel %vm439_vm3, 1.0, %v3248_v39 }
  0xa0   : > { %2907 = vmatmul.mubr.msk.f32.vlgmr.msra.gmra.mrb[0].mxu1 %vm582_vm0, %v3423_v43  ;;  %v981_v35 = vpack.c.bf16 %v3423_v43, %v3416_v40 }
  0xa1   : > { %v483_v45 = vpop.permute.xlu1 %482  ;;  %2909 = vmatprep.mubr.msk.f32.mxu1 %vm582_vm0, %v3426_v44  ;;  %3165 = vmatpush3.bf16.msra.mxu1 %v3320_v4  ;;  %v420_v46 = vpop.permute.xlu0 %419  ;;  %v3524_v4 = vsel %vm530_vm1, 1.0, %v3248_v39 }
  0xa2   : > { %vm442_vm5 = vcmp.eq.s32.totalorder %v3412_v36, %v420_v46  ;;  %3167 = vmatprep.subr.bf16.mxu1 %v3350_v12  ;;  %vm527_vm12 = vcmp.eq.s32.totalorder %v3412_v36, %v483_v45 }
  0xa3   : > { %v3441_v48 = vsel %vm442_vm5, 1.0, %v3248_v39  ;;  %v3496_v61 = vsel %vm527_vm12, 1.0, %v3248_v39 }
  0xa4   : > { %2910 = vmatmul.mubr.msk.f32.gmra.mrb[2].mxu1 %vm582_vm0, %v3437_v47  ;;  %v985_v46 = vpack.c.bf16 %v3496_v61, %v3481_v59 }
  0xa5   : > { %3169 = vmatpush3.bf16.msra.mxu1 %v3350_v12  ;;  %v426_v49 = vpop.permute.xlu0 %425  ;;  %2912 = vmatprep.mubr.msk.f32.mxu1 %vm582_vm0, %v3441_v48 }
  0xa6   : > { %vm444_vm7 = vcmp.eq.s32.totalorder %v3412_v36, %v426_v49  ;;  %v384_v50 = vpop.permute.xlu1 %383  ;;  %3171 = vmatprep.subr.bf16.mxu1 %v3359_v16 }
  0xa7   : > { %vm430_vm8 = vcmp.eq.s32.totalorder %v3412_v36, %v384_v50  ;;  %v3462_v53 = vsel %vm444_vm7, 1.0, %v3248_v39  ;;  %v982_v50 = vpack.c.bf16 %v3437_v47, %v3426_v44 }
  0xa8   : > { %v3456_v52 = vsel %vm430_vm8, 1.0, %v3248_v39  ;;  %2913 = vmatmul.mubr.msk.f32.gmra.mrb[4].mxu1 %vm582_vm0, %v3451_v51 }
  0xa9   : > { %2894 = vmatprep.mubr.msk.f32.mxu0 %vm582_vm0, %v3456_v52  ;;  %3173 = vmatpush3.bf16.msra.mxu1 %v3359_v16  ;;  %v387_v54 = vpop.permute.xlu0 %386 }
  0xaa   : > { %vm431_vm11 = vcmp.eq.s32.totalorder %v3412_v36, %v387_v54  ;;  %2915 = vmatprep.mubr.msk.f32.mxu1 %vm582_vm0, %v3462_v53  ;;  %3175 = vmatprep.subr.bf16.mxu1 %v3374_v21 }
  0xab   : > { %v3475_v56 = vsel %vm431_vm11, 1.0, %v3248_v39  ;;  %v486_v57 = vpop.permute.xlu1 %485 }
  0xac   : > { %2895 = vmatmul.mubr.msk.f32.vlgmr.msra.gmra.mrb[0].mxu0 %vm582_vm0, %v3475_v56  ;;  %2916 = vmatmul.mubr.msk.f32.gmra.mrb[6].mxu1 %vm582_vm0, %v3472_v55  ;;  %vm528_vm13 = vcmp.eq.s32.totalorder %v3412_v36, %v486_v57  ;;  %v977_v22 = vpack.c.bf16 %v3475_v56, %v3456_v52  ;;  %v984_v57 = vpack.c.bf16 %v3472_v55, %v3462_v53 }
  0xad   : > { %3177 = vmatpush3.bf16.msra.mxu1 %v3374_v21  ;;  %2934 = vmatprep.mubr.msk.f32.mxu1 %vm582_vm0, %v3481_v59  ;;  %v390_v60 = vpop.permute.xlu0 %389  ;;  %v3505_v1 = vsel %vm528_vm13, 1.0, %v3248_v39 }
  0xae   : > { %vm432_vm14 = vcmp.eq.s32.totalorder %v3412_v36, %v390_v60  ;;  %2959 = vmatpush3.bf16.msra.mxu0 %v3402_v29  ;;  %2982 = vmatprep.subr.bf16.mxu1 %v3402_v29 }
  0xaf   : > { %v3499_v62 = vsel %vm432_vm14, 1.0, %v3248_v39  ;;  %v489_v63 = vpop.permute.xlu1 %488  ;;  %2960 = vmatprep.subr.bf16.mxu0 %v3231_v58 }
  0xb0   : > { %vm529_vm15 = vcmp.eq.s32.totalorder %v3412_v36, %v489_v63  ;;  %2935 = vmatmul.mubr.msk.f32.vlgmr.msra.gmra.mrb[8].mxu1 %vm582_vm0, %v3496_v61  ;;  %2897 = vmatprep.mubr.msk.f32.mxu0 %vm582_vm0, %v3499_v62 }
  0xb1   : > { %2937 = vmatprep.mubr.msk.f32.mxu1 %vm582_vm0, %v3505_v1  ;;  %2983 = vmatpush3.bf16.msra.mxu1 %v3402_v29  ;;  %v3518_v2 = vsel %vm529_vm15, 1.0, %v3248_v39  ;;  %v399_v6 = vpop.permute.xlu0 %398 }
  0xb2   : > { %2961 = vmatpush3.bf16.msra.mxu0 %v3231_v58  ;;  %2984 = vmatprep.subr.bf16.mxu1 %v3231_v58  ;;  %vm435_vm4 = vcmp.eq.s32.totalorder %v3412_v36, %v399_v6  ;;  %v986_v54 = vpack.c.bf16 %v3518_v2, %v3505_v1  ;;  %v1406_v6 = vld [vmem:[%s4173_s5 + $0x8] sm:$0xff] }
  0xb3   : > { %2962 = vmatprep.subr.bf16.mxu0 %v3232_v0  ;;  %v3549_v13 = vsel %vm435_vm4, 1.0, %v3248_v39  ;;  %vm2474_vm4 = vcmask 64512  }
  0xb4   : > { %v393_v5 = vpop.permute.xlu1 %392  ;;  %2938 = vmatmul.mubr.msk.f32.gmra.mrb[10].mxu1 %vm582_vm0, %v3518_v2 }
  0xb5   : > { %vm433_vm2 = vcmp.eq.s32.totalorder %v3412_v36, %v393_v5  ;;  %2940 = vmatprep.mubr.msk.f32.mxu1 %vm582_vm0, %v3524_v4  ;;  %2985 = vmatpush3.bf16.msra.mxu1 %v3231_v58  ;;  %v402_v10 = vpop.permute.xlu0 %401  ;;  %v1405_v5 = vld [vmem:[%s4173_s5] sm:$0xff] }
  0xb6   : > { %v3532_v7 = vsel %vm433_vm2, 1.0, %v3248_v39  ;;  %2963 = vmatpush3.bf16.msra.mxu0 %v3232_v0  ;;  %2986 = vmatprep.subr.bf16.mxu1 %v3232_v0  ;;  %vm436_vm5 = vcmp.eq.s32.totalorder %v3412_v36, %v402_v10  ;;  %v1403_v10 = vld [vmem:[%s4172_s4] sm:$0xff] }
  0xb7   : > { %2898 = vmatmul.mubr.msk.f32.gmra.mrb[2].mxu0 %vm582_vm0, %v3532_v7  ;;  %2964 = vmatprep.subr.bf16.mxu0 %v3233_v3  ;;  %v3554_v14 = vsel %vm436_vm5, 1.0, %v3248_v39  ;;  %v978_v25 = vpack.c.bf16 %v3532_v7, %v3499_v62 }
  0xb9   : > { %v495_v8 = vpop.permute.xlu1 %494  ;;  %2987 = vmatpush3.bf16.msra.mxu1 %v3232_v0 }
  0xba   : > { %vm531_vm3 = vcmp.eq.s32.totalorder %v3412_v36, %v495_v8  ;;  %2965 = vmatpush3.bf16.msra.mxu0 %v3233_v3  ;;  %2988 = vmatprep.subr.bf16.mxu1 %v3233_v3  ;;  %v504_v16 = vpop.permute.xlu0 %503  ;;  %v3178_v8 = vpack.c.bf16 %v1406_v6, %v1405_v5  ;;  %v3237_v5 = vld [vmem:[%s4171_s3 + $0x18] sm:$0xff]  }
  0xbb   : > { %v3538_v9 = vsel %vm531_vm3, 1.0, %v3248_v39  ;;  %vm534_vm8 = vcmp.eq.s32.totalorder %v3412_v36, %v504_v16  ;;  %v1810_v16 = vld [vmem:[%s4174_s6] sm:$0xff]  ;;  %vm1407_vm3 = vcmask 130048  }
  0xbc   : > { %2941 = vmatmul.mubr.msk.f32.gmra.mrb[12].mxu1 %vm582_vm0, %v3538_v9  ;;  %v3568_v19 = vsel %vm534_vm8, 1.0, %v3248_v39  ;;  %3179 = vmatprep.subr.bf16.mxu0 %v3178_v8 }
  0xbd   : > { %2989 = vmatpush3.bf16.msra.mxu1 %v3233_v3 }
  0xbe   : > { %v396_v11 = vpop.permute.xlu1 %395  ;;  %v513_v23 = vpop.permute.xlu0 %512 }
  0xbf   : > { %vm434_vm6 = vcmp.eq.s32.totalorder %v3412_v36, %v396_v11  ;;  %vm537_vm12 = vcmp.eq.s32.totalorder %v3412_v36, %v513_v23  ;;  %v1404_v11 = vld [vmem:[%s4172_s4 + $0x8] sm:$0xff] }
  0xc0   : > { %v3546_v12 = vsel %vm434_vm6, 1.0, %v3248_v39  ;;  %v3605_v32 = vsel %vm537_vm12, 1.0, %v3248_v39 }
  0xc1   : > { %2900 = vmatprep.mubr.msk.f32.mxu0 %vm582_vm0, %v3546_v12  ;;  %v979_v27 = vpack.c.bf16 %v3549_v13, %v3546_v12 }
  0xc2   : > { %2901 = vmatmul.mubr.msk.f32.gmra.mrb[4].mxu0 %vm582_vm0, %v3549_v13  ;;  %v519_v29 = vpop.permute.xlu0 %518 }
  0xc3   : > { %v498_v15 = vpop.permute.xlu1 %497  ;;  %2903 = vmatprep.mubr.msk.f32.mxu0 %vm582_vm0, %v3554_v14  ;;  %vm539_vm14 = vcmp.eq.s32.totalorder %v3412_v36, %v519_v29 }
  0xc4   : > { %vm532_vm7 = vcmp.eq.s32.totalorder %v3412_v36, %v498_v15  ;;  %v3622_v41 = vsel %vm539_vm14, 1.0, %v3248_v39  ;;  %v3182_v15 = vpack.c.bf16 %v1404_v11, %v1403_v10 }
  0xc5   : > { %v3562_v17 = vsel %vm532_vm7, 1.0, %v3248_v39 }
  0xc6   : > { %2943 = vmatprep.mubr.msk.f32.mxu1 %vm582_vm0, %v3562_v17  ;;  %v525_v37 = vpop.permute.xlu0 %524  ;;  %3183 = vmatprep.subr.bf16.mxu1 %v3182_v15 }
  0xc7   : > { %v501_v18 = vpop.permute.xlu1 %500  ;;  %vm541_vm1 = vcmp.eq.s32.totalorder %v3412_v36, %v525_v37 }
  0xc8   : > { %vm533_vm9 = vcmp.eq.s32.totalorder %v3412_v36, %v501_v18  ;;  %v3637_v49 = vsel %vm541_vm1, 1.0, %v3248_v39  ;;  %v1811_v18 = vld [vmem:[%s4174_s6 + $0x8] sm:$0xff] }
  0xc9   : > { %v3572_v20 = vsel %vm533_vm9, 1.0, %v3248_v39 }
  0xca   : > { %2944 = vmatmul.mubr.msk.f32.gmra.mrb[14].mxu1 %vm582_vm0, %v3572_v20  ;;  %v988_v58 = vpack.c.bf16 %v3572_v20, %v3562_v17 }
  0xcb   : > { %2946 = vmatprep.mubr.msk.f32.mxu1 %vm582_vm0, %v3568_v19 }
  0xcc   : > { %v405_v21 = vpop.permute.xlu1 %404 }
  0xcd   : > { %vm437_vm10 = vcmp.eq.s32.totalorder %v3412_v36, %v405_v21  ;;  %v3186_v21 = vpack.c.bf16 %v1811_v18, %v1810_v16 }
  0xce   : > { %v3582_v24 = vsel %vm437_vm10, 1.0, %v3248_v39 }
  0xcf   : > { %2904 = vmatmul.mubr.msk.f32.gmra.mrb[6].mxu0 %vm582_vm0, %v3582_v24  ;;  %v980_v33 = vpack.c.bf16 %v3582_v24, %v3554_v14 }
  0xd0   : > { %2966 = vmatprep.mubr.msk.bf16.mxu0 %vm582_vm0, %v977_v22  ;;  %v3234_v22 = vld [vmem:[%s4171_s3] sm:$0xff]  }
  0xd1   : > { %v507_v26 = vpop.permute.xlu1 %506 }
  0xd2   : > { %vm535_vm11 = vcmp.eq.s32.totalorder %v3412_v36, %v507_v26 }
  0xd3   : > { %v3593_v28 = vsel %vm535_vm11, 1.0, %v3248_v39  ;;  %2967 = vmatmul.mubr.msk.bf16.vlgmr.msra.gmra.mrb[8].mxu0 %vm582_vm0, %v978_v25 }
  0xd4   : > { %2947 = vmatmul.mubr.msk.f32.gmra.mrb[16].mxu1 %vm582_vm0, %v3593_v28  ;;  %2970 = vmatprep.mubr.msk.bf16.mxu0 %vm582_vm0, %v979_v27  ;;  %v989_v60 = vpack.c.bf16 %v3593_v28, %v3568_v19 }
  0xd5   : > { %v510_v30 = vpop.permute.xlu1 %509  ;;  %3181 = vmatpush3.bf16.msra.mxu0 %v3178_v8 }
  0xd6   : > { %vm536_vm13 = vcmp.eq.s32.totalorder %v3412_v36, %v510_v30  ;;  %3187 = vmatprep.subr.bf16.mxu0 %v3186_v21 }
  0xd7   : > { %v3602_v31 = vsel %vm536_vm13, 1.0, %v3248_v39 }
  0xd8   : > { %2949 = vmatprep.mubr.msk.f32.mxu1 %vm582_vm0, %v3602_v31  ;;  %v990_v63 = vpack.c.bf16 %v3605_v32, %v3602_v31 }
  0xd9   : > { %v516_v34 = vpop.permute.xlu1 %515  ;;  %2950 = vmatmul.mubr.msk.f32.gmra.mrb[18].mxu1 %vm582_vm0, %v3605_v32 }
  0xda   : > { %vm538_vm15 = vcmp.eq.s32.totalorder %v3412_v36, %v516_v34 }
  0xdb   : > { %v3618_v38 = vsel %vm538_vm15, 1.0, %v3248_v39  ;;  %2971 = vmatmul.mubr.msk.bf16.gmra.mrb[12].mxu0 %vm582_vm0, %v980_v33 }
  0xdc   : > { %2952 = vmatprep.mubr.msk.f32.mxu1 %vm582_vm0, %v3618_v38  ;;  %2974 = vmatprep.mubr.msk.bf16.mxu0 %vm582_vm0, %v981_v35  ;;  %v991_v0 = vpack.c.bf16 %v3622_v41, %v3618_v38 }
  0xdd   : > { %v522_v42 = vpop.permute.xlu1 %521  ;;  %2953 = vmatmul.mubr.msk.f32.gmra.mrb[20].mxu1 %vm582_vm0, %v3622_v41 }
  0xde   : > { %vm540_vm2 = vcmp.eq.s32.totalorder %v3412_v36, %v522_v42  ;;  %v983_v36 = vpack.c.bf16 %v3451_v51, %v3441_v48 }
  0xdf   : > { %v3632_v45 = vsel %vm540_vm2, 1.0, %v3248_v39  ;;  %v987_v39 = vpack.c.bf16 %v3538_v9, %v3524_v4 }
  0xe0   : > { %2955 = vmatprep.mubr.msk.f32.mxu1 %vm582_vm0, %v3632_v45  ;;  %v992_v3 = vpack.c.bf16 %v3637_v49, %v3632_v45 }
  0xe1   : > { %2956 = vmatmul.mubr.msk.f32.gmra.mrb[22].mxu1 %vm582_vm0, %v3637_v49 }
  0xe2   : > { %2990 = vmatprep.mubr.msk.bf16.mxu1 %vm582_vm0, %v985_v46 }
  0xe3   : > { %2975 = vmatmul.mubr.msk.bf16.gmra.mrb[16].mxu0 %vm582_vm0, %v982_v50 }
  0xe4   : > { %2978 = vmatprep.mubr.msk.bf16.mxu0 %vm582_vm0, %v983_v36 }
  0xe5   : > { %2991 = vmatmul.mubr.msk.bf16.vlgmr.msra.gmra.mrb[24].mxu1 %vm582_vm0, %v986_v54  ;;  %v3235_v54 = vld [vmem:[%s4171_s3 + $0x8] sm:$0xff]  }
  0xe6   : > { %2994 = vmatprep.mubr.msk.bf16.mxu1 %vm582_vm0, %v987_v39  ;;  %3185 = vmatpush3.bf16.msra.mxu1 %v3182_v15 }
  0xe7   : > { %3090 = vmatprep.subr.bf16.mxu1 %v3234_v22 }
  0xeb   : > { %2979 = vmatmul.mubr.msk.bf16.gmra.mrb[20].mxu0 %vm582_vm0, %v984_v57 }
  0xed   : > { %2995 = vmatmul.mubr.msk.bf16.gmra.mrb[28].mxu1 %vm582_vm0, %v988_v58 }
  0xee   : > { %2998 = vmatprep.mubr.msk.bf16.mxu1 %vm582_vm0, %v989_v60  ;;  %v3236_v60 = vld [vmem:[%s4171_s3 + $0x10] sm:$0xff]  }
  0xf5   : > { %2999 = vmatmul.mubr.msk.bf16.gmra.mrb[32].mxu1 %vm582_vm0, %v990_v63 }
  0xf6   : > { %3002 = vmatprep.mubr.msk.bf16.mxu1 %vm582_vm0, %v991_v0 }
  0xfd   : > { %3003 = vmatmul.mubr.msk.bf16.gmra.mrb[36].mxu1 %vm582_vm0, %v992_v3 }
 0x173   : > { %v3695_v23 = vpop.f32.mrb[0].mxu1 }
 0x174   : > { %v3697_v25 = vpop.f32.mrb[1].mxu1 }
 0x177   : > { %v3699_v26 = vpop.f32.mrb[2].mxu1 }
 0x178   : > { %v3701_v27 = vpop.f32.mrb[3].mxu1 }
 0x17b   : > { %v3703_v29 = vpop.f32.mrb[4].mxu1 }
 0x17c   : > { %v3705_v30 = vpop.f32.mrb[5].mxu1 }
 0x17f   : > { %v2896_v33 = vpop.f32.mrb[0].mxu0  ;;  %v3707_v34 = vpop.f32.mrb[6].mxu1 }
 0x180   : > { %v697_v35 = vpop.f32.mrb[1].mxu0  ;;  %v3709_v37 = vpop.f32.mrb[7].mxu1 }
 0x181   : > { %3010 = vmatprep.mubr.msk.f32.mxu0 %vm1407_vm3, %v697_v35 }
 0x182   : > { %3011 = vmatmul.mubr.msk.f32.vlgmr.msra.gmra.mrb[24].mxu0 %vm1407_vm3, %v2896_v33 }
 0x183   : > { %v3713_v42 = vpop.f32.mrb[8].mxu1  ;;  %3189 = vmatpush3.bf16.msra.mxu0 %v3186_v21 }
 0x184   : > { %v1388_v46 = vmul.f32 %v3713_v42, %v2896_v33  ;;  %v3716_v50 = vpop.f32.mrb[9].mxu1 }
 0x185   : > { %v1387_v36 = vmul.f32 %v3716_v50, %v697_v35 }
 0x187   : > { %v3722_v39 = vpop.f32.mrb[10].mxu1  ;;  %3038 = vmatprep.mubr.msk.f32.mxu1 %vm1407_vm3, %v1387_v36 }
 0x188   : > { %v3725_v57 = vpop.f32.mrb[11].mxu1  ;;  %3039 = vmatmul.mubr.msk.f32.vlgmr.msra.gmra.mrb[40].mxu1 %vm1407_vm3, %v1388_v46 }
 0x189   : > { %3091 = vmatpush3.bf16.msra.mxu1 %v3234_v22 }
 0x18a   : > { %v2899_v58 = vpop.f32.mrb[2].mxu0  ;;  %3092 = vmatprep.subr.bf16.mxu1 %v3235_v54 }
 0x18b   : > { %v1390_v63 = vmul.f32 %v3722_v39, %v2899_v58  ;;  %v707_v0 = vpop.f32.mrb[3].mxu0 }
 0x18c   : > { %v1389_v3 = vmul.f32 %v3725_v57, %v707_v0  ;;  %3013 = vmatprep.mubr.msk.f32.mxu0 %vm1407_vm3, %v707_v0 }
 0x18d   : > { %3014 = vmatmul.mubr.msk.f32.gmra.mrb[26].mxu0 %vm1407_vm3, %v2899_v58  ;;  %3093 = vmatpush3.bf16.msra.mxu1 %v3235_v54 }
 0x18e   : > { %3041 = vmatprep.mubr.msk.f32.mxu1 %vm1407_vm3, %v1389_v3  ;;  %3094 = vmatprep.subr.bf16.mxu1 %v3236_v60 }
 0x18f   : > { %v3739_v6 = vpop.f32.mrb[12].mxu1  ;;  %3042 = vmatmul.mubr.msk.f32.gmra.mrb[42].mxu1 %vm1407_vm3, %v1390_v63 }
 0x190   : > { %v3742_v8 = vpop.f32.mrb[13].mxu1 }
 0x191   : > { %3095 = vmatpush3.bf16.msra.mxu1 %v3236_v60 }
 0x192   : > { %3096 = vmatprep.subr.bf16.mxu1 %v3237_v5 }
 0x195   : > { %v2902_v10 = vpop.f32.mrb[4].mxu0  ;;  %3097 = vmatpush3.bf16.msra.mxu1 %v3237_v5 }
 0x196   : > { %v1392_v11 = vmul.f32 %v3739_v6, %v2902_v10  ;;  %v717_v15 = vpop.f32.mrb[5].mxu0 }
 0x197   : > { %v1391_v16 = vmul.f32 %v3742_v8, %v717_v15  ;;  %3016 = vmatprep.mubr.msk.f32.mxu0 %vm1407_vm3, %v717_v15 }
 0x198   : > { %3017 = vmatmul.mubr.msk.f32.gmra.mrb[28].mxu0 %vm1407_vm3, %v2902_v10 }
 0x199   : > { %3044 = vmatprep.mubr.msk.f32.mxu1 %vm1407_vm3, %v1391_v16 }
 0x19a   : > { %3045 = vmatmul.mubr.msk.f32.gmra.mrb[44].mxu1 %vm1407_vm3, %v1392_v11 }
 0x19d   : > { %v3750_v18 = vpop.f32.mrb[14].mxu1 }
 0x19e   : > { %v3752_v21 = vpop.f32.mrb[15].mxu1 }
 0x1a2   : > { %v2905_v22 = vpop.f32.mrb[6].mxu0 }
 0x1a3   : > { %v1394_v33 = vmul.f32 %v3750_v18, %v2905_v22  ;;  %v727_v35 = vpop.f32.mrb[7].mxu0 }
 0x1a4   : > { %v1393_v46 = vmul.f32 %v3752_v21, %v727_v35  ;;  %3019 = vmatprep.mubr.msk.f32.mxu0 %vm1407_vm3, %v727_v35 }
 0x1a5   : > { %3020 = vmatmul.mubr.msk.f32.gmra.mrb[30].mxu0 %vm1407_vm3, %v2905_v22 }
 0x1a6   : > { %v3758_v36 = vpop.f32.mrb[8].mxu0  ;;  %3022 = vmatprep.mubr.msk.f32.mxu0 %vm1407_vm3, %v3697_v25  ;;  %3047 = vmatprep.mubr.msk.f32.mxu1 %vm1407_vm3, %v1393_v46 }
 0x1a7   : > { %v1325_v54 = vmul.f32 %v3758_v36, %v3505_v1  ;;  %v3765_v58 = vpop.f32.mrb[16].mxu1  ;;  %v3767_v60 = vpop.f32.mrb[9].mxu0  ;;  %3048 = vmatmul.mubr.msk.f32.gmra.mrb[46].mxu1 %vm1407_vm3, %v1394_v33 }
 0x1a8   : > { %v1396_v63 = vmul.f32 %v3765_v58, %v3695_v23  ;;  %v3772_v0 = vpop.f32.mrb[17].mxu1  ;;  %v3774_v3 = vpop.f32.mrb[10].mxu0  ;;  %v1323_v5 = vmul.f32 %v3481_v59, %v3767_v60 }
 0x1a9   : > { %v1395_v10 = vmul.f32 %v3772_v0, %v3697_v25  ;;  %v1326_v1 = vmul.f32 %v3774_v3, %v3518_v2  ;;  %v3782_v11 = vpop.f32.mrb[11].mxu0  ;;  %3023 = vmatmul.mubr.msk.f32.gmra.mrb[32].mxu0 %vm1407_vm3, %v3695_v23  ;;  %v1345_v15 = vsel %vm582_vm0, %v1325_v54, 0.0 }
 0x1aa   : > { %3025 = vmatprep.mubr.msk.f32.mxu0 %vm1407_vm3, %v3701_v27  ;;  %1346 = vadd.xlane.f32.xlu0 %v1345_v15  ;;  %v1324_v59 = vmul.f32 %v3496_v61, %v3782_v11  ;;  %v1339_v22 = vsel %vm582_vm0, %v1323_v5, 0.0 }
 0x1ab   : > { %3050 = vmatprep.mubr.msk.f32.mxu1 %vm1407_vm3, %v1395_v10  ;;  %v1348_v25 = vsel %vm582_vm0, %v1326_v1, 0.0 }
 0x1ac   : > { %1349 = vadd.xlane.f32.xlu1 %v1348_v25  ;;  %v3793_v2 = vpop.f32.mrb[18].mxu1  ;;  %3051 = vmatmul.mubr.msk.f32.gmra.mrb[48].mxu1 %vm1407_vm3, %v1396_v63  ;;  %v1342_v54 = vsel %vm582_vm0, %v1324_v59, 0.0 }
 0x1ad   : > { %v1398_v23 = vmul.f32 %v3793_v2, %v3699_v26  ;;  %v3798_v16 = vpop.f32.mrb[19].mxu1  ;;  %3026 = vmatmul.mubr.msk.f32.gmra.mrb[34].mxu0 %vm1407_vm3, %v3699_v26 }
 0x1ae   : > { %v1397_v61 = vmul.f32 %v3798_v16, %v3701_v27  ;;  %3028 = vmatprep.mubr.msk.f32.mxu0 %vm1407_vm3, %v3705_v30  ;;  %1340 = vadd.xlane.f32.xlu0 %v1339_v22  ;;  %v3807_v33 = vpop.f32.mrb[12].mxu0 }
 0x1af   : > { %v1329_v35 = vmul.f32 %v3807_v33, %v3562_v17  ;;  %v3811_v46 = vpop.f32.mrb[13].mxu0 }
 0x1b0   : > { %1343 = vadd.xlane.f32.xlu1 %v1342_v54  ;;  %v3814_v26 = vpop.f32.mrb[20].mxu1  ;;  %v3816_v63 = vpop.f32.mrb[14].mxu0  ;;  %3053 = vmatprep.mubr.msk.f32.mxu1 %vm1407_vm3, %v1397_v61  ;;  %v1327_v27 = vmul.f32 %v3524_v4, %v3811_v46 }
 0x1b1   : > { %v1400_v5 = vmul.f32 %v3814_v26, %v3703_v29  ;;  %v1330_v17 = vmul.f32 %v3816_v63, %v3572_v20  ;;  %v3825_v10 = vpop.f32.mrb[21].mxu1  ;;  %v3827_v1 = vpop.f32.mrb[15].mxu0  ;;  %3029 = vmatmul.mubr.msk.f32.gmra.mrb[36].mxu0 %vm1407_vm3, %v3703_v29  ;;  %3054 = vmatmul.mubr.msk.f32.gmra.mrb[50].mxu1 %vm1407_vm3, %v1398_v23  ;;  %v1357_v15 = vsel %vm582_vm0, %v1329_v35, 0.0 }
 0x1b2   : > { %v1399_v4 = vmul.f32 %v3825_v10, %v3705_v30  ;;  %3031 = vmatprep.mubr.msk.f32.mxu0 %vm1407_vm3, %v3709_v37  ;;  %1358 = vadd.xlane.f32.xlu0 %v1357_v15  ;;  %v1328_v20 = vmul.f32 %v3538_v9, %v3827_v1  ;;  %v1351_v30 = vsel %vm582_vm0, %v1327_v27, 0.0 }
 0x1b3   : > { %v1360_v59 = vsel %vm582_vm0, %v1330_v17, 0.0 }
 0x1b4   : > { %1361 = vadd.xlane.f32.xlu1 %v1360_v59  ;;  %v3840_v25 = vpop.f32.mrb[22].mxu1  ;;  %3056 = vmatprep.mubr.msk.f32.mxu1 %vm1407_vm3, %v1399_v4 }
 0x1b5   : > { %v1402_v29 = vmul.f32 %v3840_v25, %v3707_v34  ;;  %v3845_v23 = vpop.f32.mrb[23].mxu1  ;;  %3032 = vmatmul.mubr.msk.f32.gmra.mrb[38].mxu0 %vm1407_vm3, %v3707_v34  ;;  %3057 = vmatmul.mubr.msk.f32.gmra.mrb[52].mxu1 %vm1407_vm3, %v1400_v5  ;;  %v1354_v34 = vsel %vm582_vm0, %v1328_v20, 0.0 }
 0x1b6   : > { %v1401_v9 = vmul.f32 %v3845_v23, %v3709_v37  ;;  %3066 = vmatprep.mubr.msk.f32.mxu0 %vm1407_vm3, %v3716_v50  ;;  %1352 = vadd.xlane.f32.xlu0 %v1351_v30  ;;  %v3855_v22 = vpop.f32.mrb[16].mxu0 }
 0x1b7   : > { %v1333_v61 = vmul.f32 %v3855_v22, %v3602_v31  ;;  %v3859_v35 = vpop.f32.mrb[17].mxu0 }
 0x1b8   : > { %1355 = vadd.xlane.f32.xlu1 %v1354_v34  ;;  %v3862_v54 = vpop.f32.mrb[18].mxu0  ;;  %v2992_v27 = vpop.f32.mrb[24].mxu1  ;;  %3059 = vmatprep.mubr.msk.f32.mxu1 %vm1407_vm3, %v1401_v9  ;;  %v1331_v37 = vmul.f32 %v3568_v19, %v3859_v35 }
 0x1b9   : > { %v1334_v50 = vmul.f32 %v3862_v54, %v3605_v32  ;;  %v2039_v5 = vmul.f32 %v2992_v27, %v3758_v36  ;;  %v3870_v17 = vpop.f32.mrb[19].mxu0  ;;  %v1196_v31 = vpop.f32.mrb[25].mxu1  ;;  %3060 = vmatmul.mubr.msk.f32.gmra.mrb[54].mxu1 %vm1407_vm3, %v1402_v29  ;;  %3067 = vmatmul.mubr.msk.f32.vlgmr.msra.gmra.mrb[40].mxu0 %vm1407_vm3, %v3713_v42  ;;  %v1369_v15 = vsel %vm582_vm0, %v1333_v61, 0.0  ;;  %v1261_v42 = vmul.f32 %v2992_v27, %v3499_v62 }
 0x1ba   : > { %v2037_v4 = vmul.f32 %v1196_v31, %v3767_v60  ;;  %3069 = vmatprep.mubr.msk.f32.mxu0 %vm1407_vm3, %v3725_v57  ;;  %1370 = vadd.xlane.f32.xlu0 %v1369_v15  ;;  %v2993_v19 = vpop.f32.mrb[26].mxu1  ;;  %v1332_v32 = vmul.f32 %v3593_v28, %v3870_v17  ;;  %v1363_v57 = vsel %vm582_vm0, %v1331_v37, 0.0  ;;  %v1259_v28 = vmul.f32 %v3456_v52, %v1196_v31 }
 0x1bb   : > { %v2040_v36 = vmul.f32 %v2993_v19, %v3774_v3  ;;  %v1199_v20 = vpop.f32.mrb[27].mxu1  ;;  %v1372_v59 = vsel %vm582_vm0, %v1334_v50, 0.0  ;;  %v1281_v52 = vsel %vm582_vm0, %v1261_v42, 0.0 }
 0x1bc   : > { %v2038_v29 = vmul.f32 %v1199_v20, %v3782_v11  ;;  %1373 = vadd.xlane.f32.xlu1 %v1372_v59  ;;  %v1366_v11 = vsel %vm582_vm0, %v1332_v32, 0.0  ;;  %v1275_v31 = vsel %vm582_vm0, %v1259_v28, 0.0 }
 0x1bd   : > { %v2054_v30 = vpack.c.bf16 %v2040_v36, %v2039_v5  ;;  %3070 = vmatmul.mubr.msk.f32.gmra.mrb[42].mxu0 %vm1407_vm3, %v3722_v39  ;;  %v1260_v39 = vmul.f32 %v3475_v56, %v1199_v20  ;;  %v1262_v56 = vmul.f32 %v2993_v19, %v3532_v7 }
 0x1be   : > { %v2053_v60 = vpack.c.bf16 %v2038_v29, %v2037_v4  ;;  %v3888_v9 = vpop.f32.mrb[20].mxu0  ;;  %3072 = vmatprep.mubr.msk.f32.mxu0 %vm1407_vm3, %v3742_v8  ;;  %1364 = vadd.xlane.f32.xlu0 %v1363_v57 }
 0x1bf   : > { %v3893_v3 = vpop.f32.mrb[21].mxu0 }
 0x1c0   : > { %v3896_v62 = vpop.f32.mrb[22].mxu0  ;;  %1367 = vadd.xlane.f32.xlu1 %v1366_v11  ;;  %v2996_v61 = vpop.f32.mrb[28].mxu1  ;;  %3098 = vmatprep.mubr.msk.bf16.mxu1 %vm582_vm0, %v2053_v60  ;;  %v1335_v11 = vmul.f32 %v3618_v38, %v3893_v3 }
 0x1c1   : > { %v2043_v34 = vmul.f32 %v2996_v61, %v3807_v33  ;;  %v3901_v27 = vpop.f32.mrb[23].mxu0  ;;  %v1212_v8 = vpop.f32.mrb[29].mxu1  ;;  %3073 = vmatmul.mubr.msk.f32.gmra.mrb[44].mxu0 %vm1407_vm3, %v3739_v6  ;;  %3099 = vmatmul.mubr.msk.bf16.vlgmr.msra.gmra.mrb[56].mxu1 %vm582_vm0, %v2054_v30  ;;  %v1265_v15 = vmul.f32 %v2996_v61, %v3554_v14 }
 0x1c2   : > { %v2041_v37 = vmul.f32 %v1212_v8, %v3811_v46  ;;  %3075 = vmatprep.mubr.msk.f32.mxu0 %vm1407_vm3, %v3752_v21  ;;  %1282 = vadd.xlane.f32.xlu0 %v1281_v52  ;;  %v2997_v50 = vpop.f32.mrb[30].mxu1  ;;  %v1278_v21 = vsel %vm582_vm0, %v1260_v39, 0.0  ;;  %v1263_v14 = vmul.f32 %v3546_v12, %v1212_v8  ;;  %v1375_v38 = vsel %vm582_vm0, %v1335_v11, 0.0 }
 0x1c3   : > { %v2044_v33 = vmul.f32 %v2997_v50, %v3816_v63  ;;  %v1215_v5 = vpop.f32.mrb[31].mxu1  ;;  %v1266_v7 = vmul.f32 %v2997_v50, %v3582_v24  ;;  %v1284_v63 = vsel %vm582_vm0, %v1262_v56, 0.0 }
 0x1c4   : > { %v2042_v6 = vmul.f32 %v1215_v5, %v3827_v1  ;;  %1276 = vadd.xlane.f32.xlu1 %v1275_v31  ;;  %v1264_v36 = vmul.f32 %v3549_v13, %v1215_v5 }
 0x1c5   : > { %v2056_v4 = vpack.c.bf16 %v2044_v33, %v2043_v34  ;;  %3076 = vmatmul.mubr.msk.f32.gmra.mrb[46].mxu0 %vm1407_vm3, %v3750_v18  ;;  %v1296_v20 = vsel %vm582_vm0, %v1266_v7, 0.0  ;;  %v2269_v33 = vld [vmem:[%s4176_s8] sm:$0xff] }
 0x1c6   : > { %v2055_v46 = vpack.c.bf16 %v2042_v6, %v2041_v37  ;;  %3078 = vmatprep.mubr.msk.f32.mxu0 %vm1407_vm3, %v3772_v0  ;;  %1279 = vadd.xlane.f32.xlu0 %v1278_v21  ;;  %v1293_v0 = vsel %vm582_vm0, %v1265_v15, 0.0 }
 0x1c8   : > { %1285 = vadd.xlane.f32.xlu1 %v1284_v63  ;;  %v3000_v1 = vpop.f32.mrb[32].mxu1  ;;  %3102 = vmatprep.mubr.msk.bf16.mxu1 %vm582_vm0, %v2055_v46 }
 0x1c9   : > { %v2047_v19 = vmul.f32 %v3000_v1, %v3855_v22  ;;  %v1228_v18 = vpop.f32.mrb[33].mxu1  ;;  %3079 = vmatmul.mubr.msk.f32.gmra.mrb[48].mxu0 %vm1407_vm3, %v3765_v58  ;;  %3103 = vmatmul.mubr.msk.bf16.gmra.mrb[60].mxu1 %vm582_vm0, %v2056_v4  ;;  %v1269_v59 = vmul.f32 %v3000_v1, %v3426_v44 }
 0x1ca   : > { %v2045_v24 = vmul.f32 %v1228_v18, %v3859_v35  ;;  %3081 = vmatprep.mubr.msk.f32.mxu0 %vm1407_vm3, %v3798_v16  ;;  %1294 = vadd.xlane.f32.xlu0 %v1293_v0  ;;  %v3001_v32 = vpop.f32.mrb[34].mxu1  ;;  %v1287_v16 = vsel %vm582_vm0, %v1263_v14, 0.0  ;;  %v1267_v44 = vmul.f32 %v3416_v40, %v1228_v18 }
 0x1cb   : > { %v2048_v12 = vmul.f32 %v3001_v32, %v3862_v54  ;;  %v1231_v22 = vpop.f32.mrb[35].mxu1  ;;  %v1270_v13 = vmul.f32 %v3001_v32, %v3437_v47  ;;  %v1290_v54 = vsel %vm582_vm0, %v1264_v36, 0.0 }
 0x1cc   : > { %v2046_v58 = vmul.f32 %v1231_v22, %v3870_v17  ;;  %1297 = vadd.xlane.f32.xlu1 %v1296_v20  ;;  %v1268_v57 = vmul.f32 %v3423_v43, %v1231_v22  ;;  %v1336_v43 = vmul.f32 %v3622_v41, %v3901_v27 }
 0x1cd   : > { %v2058_v29 = vpack.c.bf16 %v2048_v12, %v2047_v19  ;;  %3082 = vmatmul.mubr.msk.f32.gmra.mrb[50].mxu0 %vm1407_vm3, %v3793_v2  ;;  %v1308_v28 = vsel %vm582_vm0, %v1270_v13, 0.0 }
 0x1ce   : > { %v2057_v35 = vpack.c.bf16 %v2046_v58, %v2045_v24  ;;  %3084 = vmatprep.mubr.msk.f32.mxu0 %vm1407_vm3, %v3825_v10  ;;  %1288 = vadd.xlane.f32.xlu0 %v1287_v16  ;;  %v1305_v10 = vsel %vm582_vm0, %v1269_v59, 0.0  ;;  %v1302_v34 = vsel %vm582_vm0, %v1268_v57, 0.0 }
 0x1d0   : > { %1291 = vadd.xlane.f32.xlu1 %v1290_v54  ;;  %v3004_v17 = vpop.f32.mrb[36].mxu1  ;;  %3106 = vmatprep.mubr.msk.bf16.mxu1 %vm582_vm0, %v2057_v35 }
 0x1d1   : > { %v2051_v42 = vmul.f32 %v3004_v17, %v3888_v9  ;;  %v1244_v2 = vpop.f32.mrb[37].mxu1  ;;  %3085 = vmatmul.mubr.msk.f32.gmra.mrb[52].mxu0 %vm1407_vm3, %v3814_v26  ;;  %3107 = vmatmul.mubr.msk.bf16.gmra.mrb[64].mxu1 %vm582_vm0, %v2058_v29  ;;  %v1273_v52 = vmul.f32 %v3004_v17, %v3462_v53 }
 0x1d2   : > { %v2049_v47 = vmul.f32 %v1244_v2, %v3893_v3  ;;  %3087 = vmatprep.mubr.msk.f32.mxu0 %vm1407_vm3, %v3845_v23  ;;  %1306 = vadd.xlane.f32.xlu0 %v1305_v10  ;;  %v3005_v30 = vpop.f32.mrb[38].mxu1  ;;  %v1299_v23 = vsel %vm582_vm0, %v1267_v44, 0.0  ;;  %v1271_v8 = vmul.f32 %v3441_v48, %v1244_v2  ;;  %v1378_v3 = vsel %vm582_vm0, %v1336_v43, 0.0 }
 0x1d3   : > { %v2052_v40 = vmul.f32 %v3005_v30, %v3896_v62  ;;  %v1247_v60 = vpop.f32.mrb[39].mxu1  ;;  %v1337_v48 = vmul.f32 %v3888_v9, %v3632_v45  ;;  %v1317_v50 = vsel %vm582_vm0, %v1273_v52, 0.0  ;;  %v2270_v45 = vld [vmem:[%s4176_s8 + $0x8] sm:$0xff] }
 0x1d4   : > { %v2050_v26 = vmul.f32 %v1247_v60, %v3901_v27  ;;  %1309 = vadd.xlane.f32.xlu1 %v1308_v28  ;;  %v1311_v41 = vsel %vm582_vm0, %v1271_v8, 0.0  ;;  %v1274_v27 = vmul.f32 %v3005_v30, %v3472_v55  ;;  %v3190_v9 = vpack.c.bf16 %v2270_v45, %v2269_v33 }
 0x1d5   : > { %v2060_v61 = vpack.c.bf16 %v2052_v40, %v2051_v42  ;;  %3088 = vmatmul.mubr.msk.f32.gmra.mrb[54].mxu0 %vm1407_vm3, %v3840_v25  ;;  %v1272_v25 = vmul.f32 %v3451_v51, %v1247_v60  ;;  %v1338_v51 = vmul.f32 %v3896_v62, %v3637_v49  ;;  %v1381_v53 = vsel %vm582_vm0, %v1337_v48, 0.0  ;;  %v2271_v49 = vld [vmem:[%s4176_s8 + $0x10] sm:$0xff]  ;;  %v2272_v62 = vld [vmem:[%s4176_s8 + $0x18] sm:$0xff] }
 0x1d6   : > { %v2059_v39 = vpack.c.bf16 %v2050_v26, %v2049_v47  ;;  %1300 = vadd.xlane.f32.xlu0 %v1299_v23  ;;  %v1320_v56 = vsel %vm582_vm0, %v1274_v27, 0.0  ;;  %3191 = vmatprep.subr.bf16.mxu0 %v3190_v9  ;;  %v3194_v5 = vpack.c.bf16 %v2272_v62, %v2271_v49 }
 0x1d7   : > { %v1314_v37 = vsel %vm582_vm0, %v1272_v25, 0.0  ;;  %v1384_v55 = vsel %vm582_vm0, %v1338_v51, 0.0  ;;  %3193 = vmatpush3.bf16.msra.mxu0 %v3190_v9 }
 0x1d8   : > { %1303 = vadd.xlane.f32.xlu1 %v1302_v34  ;;  %3110 = vmatprep.mubr.msk.bf16.mxu1 %vm582_vm0, %v2059_v39 }
 0x1d9   : > { %3111 = vmatmul.mubr.msk.bf16.gmra.mrb[68].mxu1 %vm582_vm0, %v2060_v61  ;;  %3195 = vmatprep.subr.bf16.mxu0 %v3194_v5  ;;  %vm2280_vm0 = vcmask 261120  }
 0x1da   : > { %1376 = vadd.xlane.f32.xlu0 %v1375_v38 }
 0x1db   : > { %3197 = vmatpush3.bf16.msra.mxu0 %v3194_v5 }
 0x1dc   : > { %1379 = vadd.xlane.f32.xlu1 %v1378_v3 }
 0x1de   : > { %1312 = vadd.xlane.f32.xlu0 %v1311_v41 }
 0x1e0   : > { %1315 = vadd.xlane.f32.xlu1 %v1314_v37 }
 0x1e2   : > { %1318 = vadd.xlane.f32.xlu0 %v1317_v50 }
 0x1e4   : > { %1321 = vadd.xlane.f32.xlu1 %v1320_v56 }
 0x1e6   : > { %1382 = vadd.xlane.f32.xlu0 %v1381_v53 }
 0x1e8   : > { %1385 = vadd.xlane.f32.xlu1 %v1384_v55 }
 0x237   : > { %v3996_v31 = vpop.xlane.xlu0 %1346 }
 0x239   : > { %v3998_v6 = vpop.xlane.xlu1 %1349 }
 0x23b   : > { %v4000_v15 = vpop.xlane.xlu0 %1340 }
 0x23d   : > { %v4002_v4 = vpop.xlane.xlu1 %1343 }
 0x23f   : > { %v4004_v21 = vpop.xlane.xlu0 %1358 }
 0x241   : > { %v4006_v46 = vpop.xlane.xlu1 %1361 }
 0x243   : > { %v4008_v7 = vpop.xlane.xlu0 %1352 }
 0x245   : > { %v4010_v63 = vpop.xlane.xlu1 %1355 }
 0x247   : > { %v4012_v1 = vpop.xlane.xlu0 %1370 }
 0x249   : > { %v4014_v14 = vpop.xlane.xlu1 %1373 }
 0x24b   : > { %v4016_v19 = vpop.xlane.xlu0 %1364 }
 0x24d   : > { %v4018_v18 = vpop.xlane.xlu1 %1367 }
 0x24f   : > { %v1283_v0 = vpop.xlane.xlu0 %1282 }
 0x251   : > { %v1277_v36 = vpop.xlane.xlu1 %1276 }
 0x253   : > { %v1280_v12 = vpop.xlane.xlu0 %1279 }
 0x255   : > { %v3012_v24 = vpop.f32.mrb[24].mxu0  ;;  %v1286_v35 = vpop.xlane.xlu1 %1285 }
 0x256   : > { %v1522_v32 = vpop.f32.mrb[25].mxu0  ;;  %v1602_v22 = vmul.f32 %v3012_v24, %v1280_v12 }
 0x257   : > { %v1601_v20 = vmul.f32 %v1522_v32, %v1277_v36  ;;  %v1295_v47 = vpop.xlane.xlu0 %1294 }
 0x259   : > { %v1298_v57 = vpop.xlane.xlu1 %1297 }
 0x25b   : > { %v3040_v58 = vpop.f32.mrb[40].mxu1  ;;  %v1289_v40 = vpop.xlane.xlu0 %1288 }
 0x25c   : > { %v4020_v59 = vadd.f32 %v3040_v58, %v1602_v22  ;;  %v1731_v29 = vpop.f32.mrb[41].mxu1 }
 0x25d   : > { %v4022_v16 = vadd.f32 %v1731_v29, %v1601_v20  ;;  %v1292_v60 = vpop.xlane.xlu1 %1291 }
 0x25f   : > { %v1307_v8 = vpop.xlane.xlu0 %1306 }
 0x260   : > { %v3015_v13 = vpop.f32.mrb[26].mxu0 }
 0x261   : > { %v1604_v54 = vmul.f32 %v3015_v13, %v1286_v35  ;;  %v1532_v17 = vpop.f32.mrb[27].mxu0  ;;  %v1310_v38 = vpop.xlane.xlu1 %1309 }
 0x262   : > { %v1603_v44 = vmul.f32 %v1532_v17, %v1283_v0  ;;  %v3043_v42 = vpop.f32.mrb[42].mxu1 }
 0x263   : > { %v4024_v2 = vadd.f32 %v3043_v42, %v1604_v54  ;;  %v1741_v10 = vpop.f32.mrb[43].mxu1  ;;  %v1301_v25 = vpop.xlane.xlu0 %1300 }
 0x264   : > { %v4026_v30 = vadd.f32 %v1741_v10, %v1603_v44 }
 0x265   : > { %v1304_v3 = vpop.xlane.xlu1 %1303 }
 0x267   : > { %v4034_v56 = vpop.xlane.xlu0 %1376 }
 0x269   : > { %v4038_v33 = vpop.xlane.xlu1 %1379 }
 0x26b   : > { %v3018_v28 = vpop.f32.mrb[28].mxu0  ;;  %v1313_v12 = vpop.xlane.xlu0 %1312 }
 0x26c   : > { %v1606_v26 = vmul.f32 %v3018_v28, %v1292_v60  ;;  %v1542_v11 = vpop.f32.mrb[29].mxu0 }
 0x26d   : > { %v1605_v61 = vmul.f32 %v1542_v11, %v1289_v40  ;;  %v3046_v23 = vpop.f32.mrb[44].mxu1  ;;  %v1316_v22 = vpop.xlane.xlu1 %1315 }
 0x26e   : > { %v4028_v39 = vadd.f32 %v3046_v23, %v1606_v26  ;;  %v1751_v43 = vpop.f32.mrb[45].mxu1 }
 0x26f   : > { %v4030_v34 = vadd.f32 %v1751_v43, %v1605_v61  ;;  %v1319_v61 = vpop.xlane.xlu0 %1318 }
 0x271   : > { %v1322_v26 = vpop.xlane.xlu1 %1321 }
 0x278   : > { %v3021_v52 = vpop.f32.mrb[30].mxu0 }
 0x279   : > { %v1608_v41 = vmul.f32 %v3021_v52, %v1298_v57  ;;  %v1552_v27 = vpop.f32.mrb[31].mxu0 }
 0x27a   : > { %v1607_v37 = vmul.f32 %v1552_v27, %v1295_v47  ;;  %v3049_v48 = vpop.f32.mrb[46].mxu1 }
 0x27b   : > { %v4032_v50 = vadd.f32 %v3049_v48, %v1608_v41  ;;  %v1761_v51 = vpop.f32.mrb[47].mxu1 }
 0x27c   : > { %v4036_v53 = vadd.f32 %v1761_v51, %v1607_v37  ;;  %v3024_v55 = vpop.f32.mrb[32].mxu0 }
 0x27d   : > { %v1610_v45 = vmul.f32 %v3024_v55, %v1304_v3  ;;  %v1562_v9 = vpop.f32.mrb[33].mxu0 }
 0x27e   : > { %v1609_v49 = vmul.f32 %v1562_v9, %v1301_v25 }
 0x27f   : > { %v3052_v62 = vpop.f32.mrb[48].mxu1 }
 0x280   : > { %v4040_v5 = vadd.f32 %v3052_v62, %v1610_v45  ;;  %v3027_v0 = vpop.f32.mrb[34].mxu0  ;;  %v1771_v24 = vpop.f32.mrb[49].mxu1 }
 0x281   : > { %v4042_v32 = vadd.f32 %v1771_v24, %v1609_v49  ;;  %v1572_v36 = vpop.f32.mrb[35].mxu0  ;;  %v1612_v20 = vmul.f32 %v3027_v0, %v1310_v38 }
 0x282   : > { %v1611_v58 = vmul.f32 %v1572_v36, %v1307_v8 }
 0x284   : > { %v3030_v29 = vpop.f32.mrb[36].mxu0  ;;  %v3055_v35 = vpop.f32.mrb[50].mxu1 }
 0x285   : > { %v4044_v13 = vadd.f32 %v3055_v35, %v1612_v20  ;;  %v1582_v54 = vpop.f32.mrb[37].mxu0  ;;  %v1781_v17 = vpop.f32.mrb[51].mxu1  ;;  %v1614_v42 = vmul.f32 %v3030_v29, %v1316_v22 }
 0x286   : > { %v4046_v44 = vadd.f32 %v1781_v17, %v1611_v58  ;;  %v1613_v10 = vmul.f32 %v1582_v54, %v1313_v12 }
 0x288   : > { %v3033_v47 = vpop.f32.mrb[38].mxu0  ;;  %v3058_v57 = vpop.f32.mrb[52].mxu1 }
 0x289   : > { %v4048_v40 = vadd.f32 %v3058_v57, %v1614_v42  ;;  %v1592_v60 = vpop.f32.mrb[39].mxu0  ;;  %v1791_v28 = vpop.f32.mrb[53].mxu1  ;;  %v1616_v23 = vmul.f32 %v3033_v47, %v1322_v26 }
 0x28a   : > { %v4050_v11 = vadd.f32 %v1791_v28, %v1613_v10  ;;  %v1615_v43 = vmul.f32 %v1592_v60, %v1319_v61 }
 0x28c   : > { %v3061_v8 = vpop.f32.mrb[54].mxu1  ;;  %v3068_v38 = vpop.f32.mrb[40].mxu0 }
 0x28d   : > { %v4052_v25 = vadd.f32 %v3061_v8, %v1616_v23  ;;  %v2006_v3 = vmul.f32 %v3068_v38, %v4002_v4  ;;  %v1801_v52 = vpop.f32.mrb[55].mxu1  ;;  %v1926_v41 = vpop.f32.mrb[41].mxu0 }
 0x28e   : > { %v4055_v27 = vadd.f32 %v1801_v52, %v1615_v43  ;;  %v2005_v37 = vmul.f32 %v1926_v41, %v4000_v15  ;;  %v4068_v15 = vld [vmem:[%s4175_s7] ss:$0 sm:$0xff] }
 0x28f   : > { %v2022_v48 = vadd.f32 %v2006_v3, %v4020_v59 }
 0x290   : > { %v3071_v51 = vpop.f32.mrb[42].mxu0  ;;  %v2021_v55 = vadd.f32 %v2005_v37, %v4022_v16 }
 0x291   : > { %v2008_v45 = vmul.f32 %v3071_v51, %v3998_v6  ;;  %v1936_v9 = vpop.f32.mrb[43].mxu0 }
 0x292   : > { %v2007_v49 = vmul.f32 %v1936_v9, %v3996_v31 }
 0x293   : > { %v2024_v62 = vadd.f32 %v2008_v45, %v4024_v2 }
 0x294   : > { %v3074_v0 = vpop.f32.mrb[44].mxu0  ;;  %v2023_v4 = vadd.f32 %v2007_v49, %v4026_v30  ;;  %v3100_v24 = vpop.f32.mrb[56].mxu1 }
 0x295   : > { %v2010_v36 = vmul.f32 %v3074_v0, %v4010_v63  ;;  %v1946_v59 = vpop.f32.mrb[45].mxu0  ;;  %v2151_v16 = vpop.f32.mrb[57].mxu1 }
 0x296   : > { %v2216_v12 = vadd.f32 %v3100_v24, %v2023_v4  ;;  %v2009_v6 = vmul.f32 %v1946_v59, %v4008_v7  ;;  %v2214_v22 = vadd.f32 %v2151_v16, %v2021_v55  ;;  %v3101_v31 = vpop.f32.mrb[58].mxu1 }
 0x297   : > { %v2217_v20 = vadd.f32 %v3101_v31, %v2024_v62  ;;  %v2154_v2 = vpop.f32.mrb[59].mxu1  ;;  %v2026_v58 = vadd.f32 %v2010_v36, %v4028_v39 }
 0x298   : > { %v2237_v30 = vadd.f32 %v4068_v15, %v2214_v22  ;;  %v2215_v29 = vadd.f32 %v2154_v2, %v2022_v48  ;;  %v3077_v63 = vpop.f32.mrb[46].mxu0  ;;  %v2025_v35 = vadd.f32 %v2009_v6, %v4030_v34  ;;  %v2239_v54 = vadd.f32 %v4068_v15, %v2216_v12  ;;  %v1386_v2 = vpop.xlane.xlu1 %1385 }
 0x299   : > { %v2012_v17 = vmul.f32 %v3077_v63, %v4006_v46  ;;  %v1956_v42 = vpop.f32.mrb[47].mxu0  ;;  %v2240_v39 = vadd.f32 %v4068_v15, %v2217_v20 }
 0x29a   : > { %v2253_v10 = vmax.f32 %v2237_v30, 0.0  ;;  %v2238_v7 = vadd.f32 %v4068_v15, %v2215_v29  ;;  %v2011_v47 = vmul.f32 %v1956_v42, %v4004_v21  ;;  %v2255_v61 = vmax.f32 %v2239_v54, 0.0 }
 0x29b   : > { %v2028_v57 = vadd.f32 %v2012_v17, %v4032_v50  ;;  %v2256_v41 = vmax.f32 %v2240_v39, 0.0 }
 0x29c   : > { %v2254_v60 = vmax.f32 %v2238_v7, 0.0  ;;  %v3080_v28 = vpop.f32.mrb[48].mxu0  ;;  %v2027_v26 = vadd.f32 %v2011_v47, %v4036_v53  ;;  %v3104_v34 = vpop.f32.mrb[60].mxu1  ;;  %3122 = vmatprep.mubr.msk.f32.mxu0 %vm2280_vm0, %v2253_v10 }
 0x29d   : > { %v2014_v46 = vmul.f32 %v3080_v28, %v4018_v18  ;;  %v1966_v23 = vpop.f32.mrb[49].mxu0  ;;  %v2167_v43 = vpop.f32.mrb[61].mxu1 }
 0x29e   : > { %v2220_v8 = vadd.f32 %v3104_v34, %v2027_v26  ;;  %v2013_v38 = vmul.f32 %v1966_v23, %v4016_v19  ;;  %v2218_v21 = vadd.f32 %v2167_v43, %v2025_v35  ;;  %v3105_v3 = vpop.f32.mrb[62].mxu1  ;;  %3123 = vmatmul.mubr.msk.f32.vlgmr.msra.gmra.mrb[56].mxu0 %vm2280_vm0, %v2254_v60  ;;  %v1383_v35 = vpop.xlane.xlu0 %1382 }
 0x29f   : > { %v2221_v50 = vadd.f32 %v3105_v3, %v2028_v57  ;;  %v2170_v52 = vpop.f32.mrb[63].mxu1  ;;  %3125 = vmatprep.mubr.msk.f32.mxu0 %vm2280_vm0, %v2255_v61  ;;  %v2030_v53 = vadd.f32 %v2014_v46, %v4040_v5 }
 0x2a0   : > { %v2241_v37 = vadd.f32 %v4068_v15, %v2218_v21  ;;  %v2219_v48 = vadd.f32 %v2170_v52, %v2026_v58  ;;  %v3083_v18 = vpop.f32.mrb[50].mxu0  ;;  %v2029_v51 = vadd.f32 %v2013_v38, %v4042_v32  ;;  %v2243_v55 = vadd.f32 %v4068_v15, %v2220_v8 }
 0x2a1   : > { %v2016_v19 = vmul.f32 %v3083_v18, %v4014_v14  ;;  %v1976_v45 = vpop.f32.mrb[51].mxu0  ;;  %v2244_v0 = vadd.f32 %v4068_v15, %v2221_v50 }
 0x2a2   : > { %v2257_v9 = vmax.f32 %v2241_v37, 0.0  ;;  %v2242_v49 = vadd.f32 %v4068_v15, %v2219_v48  ;;  %v2015_v62 = vmul.f32 %v1976_v45, %v4012_v1  ;;  %3126 = vmatmul.mubr.msk.f32.gmra.mrb[58].mxu0 %vm2280_vm0, %v2256_v41  ;;  %v2259_v14 = vmax.f32 %v2243_v55, 0.0  ;;  %v2701_v41 = vld [vmem:[%s4177_s9] ss:$0 sm:$0xff] }
 0x2a3   : > { %v2032_v5 = vadd.f32 %v2016_v19, %v4044_v13  ;;  %v2260_v58 = vmax.f32 %v2244_v0, 0.0 }
 0x2a4   : > { %v2258_v4 = vmax.f32 %v2242_v49, 0.0  ;;  %v3086_v24 = vpop.f32.mrb[52].mxu0  ;;  %v2031_v32 = vadd.f32 %v2015_v62, %v4046_v44  ;;  %v3108_v36 = vpop.f32.mrb[64].mxu1  ;;  %3128 = vmatprep.mubr.msk.f32.mxu0 %vm2280_vm0, %v2257_v9 }
 0x2a5   : > { %v2018_v59 = vmul.f32 %v3086_v24, %v4038_v33  ;;  %v1986_v16 = vpop.f32.mrb[53].mxu0  ;;  %v2183_v12 = vpop.f32.mrb[65].mxu1 }
 0x2a6   : > { %v2224_v6 = vadd.f32 %v3108_v36, %v2031_v32  ;;  %v2017_v1 = vmul.f32 %v1986_v16, %v4034_v56  ;;  %v2222_v22 = vadd.f32 %v2183_v12, %v2029_v51  ;;  %v3109_v31 = vpop.f32.mrb[66].mxu1  ;;  %3129 = vmatmul.mubr.msk.f32.gmra.mrb[60].mxu0 %vm2280_vm0, %v2258_v4 }
 0x2a7   : > { %v2225_v13 = vadd.f32 %v3109_v31, %v2032_v5  ;;  %v2186_v20 = vpop.f32.mrb[67].mxu1  ;;  %3131 = vmatprep.mubr.msk.f32.mxu0 %vm2280_vm0, %v2259_v14  ;;  %v2034_v44 = vadd.f32 %v2018_v59, %v4048_v40 }
 0x2a8   : > { %v2245_v30 = vadd.f32 %v4068_v15, %v2222_v22  ;;  %v2223_v33 = vadd.f32 %v2186_v20, %v2030_v53  ;;  %v3089_v29 = vpop.f32.mrb[54].mxu0  ;;  %v2033_v63 = vadd.f32 %v2017_v1, %v4050_v11  ;;  %v2247_v56 = vadd.f32 %v4068_v15, %v2224_v6 }
 0x2a9   : > { %v2020_v54 = vmul.f32 %v3089_v29, %v1386_v2  ;;  %v1996_v17 = vpop.f32.mrb[55].mxu0  ;;  %v2248_v47 = vadd.f32 %v4068_v15, %v2225_v13 }
 0x2aa   : > { %v2261_v42 = vmax.f32 %v2245_v30, 0.0  ;;  %v2246_v10 = vadd.f32 %v4068_v15, %v2223_v33  ;;  %v2019_v7 = vmul.f32 %v1996_v17, %v1383_v35  ;;  %3132 = vmatmul.mubr.msk.f32.gmra.mrb[62].mxu0 %vm2280_vm0, %v2260_v58  ;;  %v2263_v11 = vmax.f32 %v2247_v56, 0.0 }
 0x2ab   : > { %v2036_v40 = vadd.f32 %v2020_v54, %v4052_v25  ;;  %v2264_v25 = vmax.f32 %v2248_v47, 0.0 }
 0x2ac   : > { %v2262_v57 = vmax.f32 %v2246_v10, 0.0  ;;  %v2035_v39 = vadd.f32 %v2019_v7, %v4055_v27  ;;  %v3112_v60 = vpop.f32.mrb[68].mxu1  ;;  %3134 = vmatprep.mubr.msk.f32.mxu0 %vm2280_vm0, %v2261_v42 }
 0x2ad   : > { %v2199_v28 = vpop.f32.mrb[69].mxu1 }
 0x2ae   : > { %v2228_v26 = vadd.f32 %v3112_v60, %v2035_v39  ;;  %v2226_v34 = vadd.f32 %v2199_v28, %v2033_v63  ;;  %v3113_v61 = vpop.f32.mrb[70].mxu1  ;;  %3135 = vmatmul.mubr.msk.f32.gmra.mrb[64].mxu0 %vm2280_vm0, %v2262_v57 }
 0x2af   : > { %v2229_v46 = vadd.f32 %v3113_v61, %v2036_v40  ;;  %v2202_v23 = vpop.f32.mrb[71].mxu1  ;;  %3137 = vmatprep.mubr.msk.f32.mxu0 %vm2280_vm0, %v2263_v11 }
 0x2b0   : > { %v2249_v43 = vadd.f32 %v4068_v15, %v2226_v34  ;;  %v2227_v8 = vadd.f32 %v2202_v23, %v2034_v44  ;;  %v2251_v27 = vadd.f32 %v4068_v15, %v2228_v26 }
 0x2b1   : > { %v2252_v3 = vadd.f32 %v4068_v15, %v2229_v46 }
 0x2b2   : > { %v2265_v38 = vmax.f32 %v2249_v43, 0.0  ;;  %v2250_v21 = vadd.f32 %v4068_v15, %v2227_v8  ;;  %3138 = vmatmul.mubr.msk.f32.gmra.mrb[66].mxu0 %vm2280_vm0, %v2264_v25  ;;  %v2267_v52 = vmax.f32 %v2251_v27, 0.0 }
 0x2b3   : > { %v2268_v53 = vmax.f32 %v2252_v3, 0.0 }
 0x2b4   : > { %v2266_v50 = vmax.f32 %v2250_v21, 0.0  ;;  %3140 = vmatprep.mubr.msk.f32.mxu0 %vm2280_vm0, %v2265_v38 }
 0x2b6   : > { %3141 = vmatmul.mubr.msk.f32.gmra.mrb[68].mxu0 %vm2280_vm0, %v2266_v50 }
 0x2b7   : > { %3143 = vmatprep.mubr.msk.f32.mxu0 %vm2280_vm0, %v2267_v52 }
 0x2ba   : > { %3144 = vmatmul.mubr.msk.f32.gmra.mrb[70].mxu0 %vm2280_vm0, %v2268_v53 }
 0x371   : > { %v3124_v15 = vpop.f32.mrb[56].mxu0 }
 0x372   : > { %v2401_v37 = vadd.f32 %v3124_v15, %v2701_v41  ;;  %v2395_v48 = vpop.f32.mrb[57].mxu0 }
 0x373   : > { %v2396_v18 = vadd.f32 %v2701_v41, %v2395_v48 }
 0x374   : > { %2476 = vst.msk [vmem:[%s4131_s27 + $0x8] sm:$0xff] %vm2474_vm4, %v2401_v37 }
 0x375   : > { %2475 = vst.msk [vmem:[%s4131_s27] sm:$0xff] %vm2474_vm4, %v2396_v18  ;;  %v3127_v51 = vpop.f32.mrb[58].mxu0 }
 0x376   : > { %v2411_v55 = vadd.f32 %v3127_v51, %v2701_v41  ;;  %v2405_v19 = vpop.f32.mrb[59].mxu0 }
 0x377   : > { %v2406_v45 = vadd.f32 %v2701_v41, %v2405_v19 }
 0x378   : > { %2478 = vst.msk [vmem:[%s4131_s27 + $0x18] sm:$0xff] %vm2474_vm4, %v2411_v55 }
 0x379   : > { %2477 = vst.msk [vmem:[%s4131_s27 + $0x10] sm:$0xff] %vm2474_vm4, %v2406_v45  ;;  %v3130_v9 = vpop.f32.mrb[60].mxu0 }
 0x37a   : > { %v2421_v49 = vadd.f32 %v3130_v9, %v2701_v41  ;;  %v2415_v62 = vpop.f32.mrb[61].mxu0 }
 0x37b   : > { %v2416_v5 = vadd.f32 %v2701_v41, %v2415_v62 }
 0x37c   : > { %2480 = vst.msk [vmem:[%s4131_s27 + $0x28] sm:$0xff] %vm2474_vm4, %v2421_v49 }
 0x37d   : > { %2479 = vst.msk [vmem:[%s4131_s27 + $0x20] sm:$0xff] %vm2474_vm4, %v2416_v5  ;;  %v3133_v0 = vpop.f32.mrb[62].mxu0 }
 0x37e   : > { %v2431_v4 = vadd.f32 %v3133_v0, %v2701_v41  ;;  %v2425_v24 = vpop.f32.mrb[63].mxu0 }
 0x37f   : > { %v2426_v32 = vadd.f32 %v2701_v41, %v2425_v24 }
 0x380   : > { %2482 = vst.msk [vmem:[%s4131_s27 + $0x38] sm:$0xff] %vm2474_vm4, %v2431_v4 }
 0x381   : > { %2481 = vst.msk [vmem:[%s4131_s27 + $0x30] sm:$0xff] %vm2474_vm4, %v2426_v32  ;;  %v3136_v36 = vpop.f32.mrb[64].mxu0 }
 0x382   : > { %v2441_v14 = vadd.f32 %v3136_v36, %v2701_v41  ;;  %v2435_v59 = vpop.f32.mrb[65].mxu0 }
 0x383   : > { %v2436_v16 = vadd.f32 %v2701_v41, %v2435_v59 }
 0x384   : > { %2484 = vst.msk [vmem:[%s4131_s27 + $0x48] sm:$0xff] %vm2474_vm4, %v2441_v14 }
 0x385   : > { %2483 = vst.msk [vmem:[%s4131_s27 + $0x40] sm:$0xff] %vm2474_vm4, %v2436_v16  ;;  %v3139_v12 = vpop.f32.mrb[66].mxu0 }
 0x386   : > { %v2451_v6 = vadd.f32 %v3139_v12, %v2701_v41  ;;  %v2445_v1 = vpop.f32.mrb[67].mxu0 }
 0x387   : > { %v2446_v22 = vadd.f32 %v2701_v41, %v2445_v1 }
 0x388   : > { %2486 = vst.msk [vmem:[%s4131_s27 + $0x58] sm:$0xff] %vm2474_vm4, %v2451_v6 }
 0x389   : > { %2485 = vst.msk [vmem:[%s4131_s27 + $0x50] sm:$0xff] %vm2474_vm4, %v2446_v22  ;;  %v3142_v31 = vpop.f32.mrb[68].mxu0 }
 0x38a   : > { %v2461_v13 = vadd.f32 %v3142_v31, %v2701_v41  ;;  %v2455_v20 = vpop.f32.mrb[69].mxu0 }
 0x38b   : > { %v2456_v44 = vadd.f32 %v2701_v41, %v2455_v20 }
 0x38c   : > { %2488 = vst.msk [vmem:[%s4131_s27 + $0x68] sm:$0xff] %vm2474_vm4, %v2461_v13 }
 0x38d   : > { %2487 = vst.msk [vmem:[%s4131_s27 + $0x60] sm:$0xff] %vm2474_vm4, %v2456_v44  ;;  %v3145_v2 = vpop.f32.mrb[70].mxu0 }
 0x38e   : > { %v2471_v58 = vadd.f32 %v3145_v2, %v2701_v41  ;;  %v2465_v30 = vpop.f32.mrb[71].mxu0 }
 0x38f   : > { %v2466_v33 = vadd.f32 %v2701_v41, %v2465_v30 }
 0x390   : > { %2490 = vst.msk [vmem:[%s4131_s27 + $0x78] sm:$0xff] %vm2474_vm4, %v2471_v58 }
 0x391   : > { %2489 = vst.msk [vmem:[%s4131_s27 + $0x70] sm:$0xff] %vm2474_vm4, %v2466_v33 }
 0x392 PF: > { %s20_s13 = sadd.s32 1, %s3244_s13  }
 0x393   : > { %p17_p4 = scmp.ge.s32.totalorder %s20_s13, 6  }
 0x395   :  { %19 = sbr.rel (!%p17_p4) target bundleno = 1 (0x1), region = 90 }

</bundles_post_ra>
